<compile_context>
chip_gen: v5e
topology: v5e:2x2
jax: 0.10.0
libtpu: 0.0.40
codegen_flags: <defaults>
</compile_context>

<pallas_src>
import functools

import jax
import jax.numpy as jnp
from jax import lax
from jax.experimental import pallas as pl
from jax.experimental.pallas import tpu as pltpu

BN_EPS = 1e-5


# ----------------------------- fused Pallas kernel ---------------------------

def _fused_forward_kernel(x1_ref, x2_ref, enc_w_ref, proj_w1_ref,
                          bn_aff_ref, proj_w2_ref, loss_ref,
                          *, batch_size, lambd):
    """Entire GenerativeRepresentation.forward in one VMEM-resident kernel."""
    B = x1_ref.shape[0]
    E = proj_w2_ref.shape[1]

    gamma = bn_aff_ref[0:1, :]     # (1, E)
    beta = bn_aff_ref[1:2, :]      # (1, E)

    inv_b = 1.0 / batch_size

    def bn(y):
        # BatchNorm1d, training-mode (biased variance over the batch).
        # One-pass statistics: two independent sublane reductions, then VPU.
        s1 = jnp.sum(y, axis=0, keepdims=True)
        s2 = jnp.sum(y * y, axis=0, keepdims=True)
        m = s1 * inv_b
        v = s2 * inv_b - m * m
        return (y - m) * lax.rsqrt(v + BN_EPS)

    def view_chain(x):
        # Encoder: flatten -> Linear(in_dim, rep_dim, bias=False).
        z = jnp.dot(x, enc_w_ref[...], preferred_element_type=jnp.float32)
        # Projector L1: Linear(rep_dim, emb_dim, bias=False) -> BN(affine) -> ReLU.
        h = jnp.dot(z, proj_w1_ref[...], preferred_element_type=jnp.float32)
        h = jnp.maximum(bn(h) * gamma + beta, 0.0)
        # Projector L2: Linear(emb_dim, emb_dim).  proj_b2 is omitted: the
        # per-feature bias is exactly cancelled by the mean subtraction of the
        # following affine-free BatchNorm, so it has no effect on the loss.
        y = jnp.dot(h, proj_w2_ref[...], preferred_element_type=jnp.float32)
        # Affine-free BN (self.bn in the PyTorch module).
        return bn(y)

    a1 = view_chain(x1_ref[...])   # (B, E)
    a2 = view_chain(x2_ref[...])   # (B, E)

    # diag(c)[e] = (1/B) * sum_b a1[b,e] * a2[b,e]   (no (E,E) matrix needed)
    diag = jnp.sum(a1 * a2, axis=0, keepdims=True) * inv_b        # (1, E)
    on_diag = jnp.sum((diag - 1.0) ** 2)
    sum_diag2 = jnp.sum(diag * diag)

    if B < E:
        # B << E: never materialize c.
        # sum(c^2) = (1/B^2) * sum((a1 a1^T) * (a2 a2^T))  -- two (B,B) Grams.
        g1 = lax.dot_general(a1, a1, (((1,), (1,)), ((), ())),
                             preferred_element_type=jnp.float32)  # (B, B)
        g2 = lax.dot_general(a2, a2, (((1,), (1,)), ((), ())),
                             preferred_element_type=jnp.float32)  # (B, B)
        sum_c2 = jnp.sum(g1 * g2) * (inv_b * inv_b)
    else:
        # Large-batch regime: materialize c once, no masks needed.
        c = lax.dot_general(a1, a2, (((0,), (0,)), ((), ())),
                            preferred_element_type=jnp.float32) * inv_b
        sum_c2 = jnp.sum(c * c)

    # loss = on_diag + lambd * off_diag, with off_diag = sum(c^2) - sum(diag^2)
    loss_ref[0, 0] = on_diag + lambd * (sum_c2 - sum_diag2)


# ------------------------------ pallas_call wrapper ---------------------------

def generative_representation_forward(params, x1, x2, batch_size, lambd):
    assert x1.shape == x2.shape
    assert batch_size == x1.shape[0], "batch_size must equal the view batch"
    n = x1.shape[0]
    x1f = x1.reshape(n, -1)
    x2f = x2.reshape(n, -1)

    in_dim, rep_dim = params["enc_w"].shape
    emb_dim = params["proj_w2"].shape[1]

    kernel = functools.partial(_fused_forward_kernel,
                               batch_size=float(batch_size),
                               lambd=float(lambd))
    vmem = pl.BlockSpec(memory_space=pltpu.MemorySpace.VMEM)

    operands = (x1f, x2f,
                params["enc_w"], params["proj_w1"],
                params["bn_affine"], params["proj_w2"])

    # Advisory cost estimate: 3 matmuls per view + 2 Gram matmuls + BN rsqrts.
    flops = (2 * 2 * n * (in_dim * rep_dim + rep_dim * emb_dim + emb_dim * emb_dim)
             + 2 * 2 * n * n * emb_dim)
    bytes_accessed = sum(int(o.size) * o.dtype.itemsize for o in operands) + 4
    cost = pl.CostEstimate(flops=flops,
                           transcendentals=4 * emb_dim,
                           bytes_accessed=bytes_accessed)

    out = pl.pallas_call(
        kernel,
        out_shape=jax.ShapeDtypeStruct((1, 1), jnp.float32),
        in_specs=[vmem] * len(operands),
        out_specs=pl.BlockSpec(memory_space=pltpu.MemorySpace.SMEM),
        cost_estimate=cost,
    )(*operands)
    return out[0, 0]


# ------------------------------ params ---------------------------------------

def init_params(key, in_dim, rep_dim, emb_dim, num_classes):
    ks = jax.random.split(key, 5)
    gamma = jnp.ones((1, emb_dim), jnp.float32)     # PyTorch BN default init
    beta = jnp.zeros((1, emb_dim), jnp.float32)
    p = {
        # synthetic encoder: flatten -> Linear(in_dim, rep_dim, bias=False)
        "enc_w": jax.random.normal(ks[0], (in_dim, rep_dim), jnp.float32)
                 * (1.0 / jnp.sqrt(in_dim)),
        # projector: Linear(rep_dim, emb_dim, bias=False)
        "proj_w1": jax.random.normal(ks[1], (rep_dim, emb_dim), jnp.float32)
                   * (1.0 / jnp.sqrt(rep_dim)),
        # BatchNorm1d(emb_dim) affine params, packed: row 0 = gamma, row 1 = beta
        "bn_affine": jnp.concatenate([gamma, beta], axis=0),
        # projector: Linear(emb_dim, emb_dim)
        "proj_w2": jax.random.normal(ks[2], (emb_dim, emb_dim), jnp.float32)
                   * (1.0 / jnp.sqrt(emb_dim)),
        # kept for module parity / reference check; mathematically dead in the
        # forward (cancelled by the affine-free BN) so the kernel skips it.
        "proj_b2": jax.random.normal(ks[3], (1, emb_dim), jnp.float32) * 0.01,
        # head (unused in forward(), kept for parity with __init__)
        "head_w": jax.random.normal(ks[4], (rep_dim, num_classes), jnp.float32)
                  * (1.0 / jnp.sqrt(rep_dim)),
        "head_b": jnp.zeros((1, num_classes), jnp.float32),
    }
    return p


# ------------------------------ reference (pure JAX) --------------------------

def _ref_forward(params, x1, x2, batch_size, lambd):
    gamma = params["bn_affine"][0:1, :]
    beta = params["bn_affine"][1:2, :]

    def bn(y, affine=False):
        m = jnp.mean(y, axis=0, keepdims=True)
        v = jnp.mean((y - m) ** 2, axis=0, keepdims=True)
        yn = (y - m) / jnp.sqrt(v + BN_EPS)
        if affine:
            yn = yn * gamma + beta
        return yn

    def enc(x):
        return x.reshape(x.shape[0], -1).astype(jnp.float32) @ params["enc_w"]

    def proj(z):
        h = z @ params["proj_w1"]
        h = jnp.maximum(bn(h, affine=True), 0.0)
        # Reference keeps the bias (exact PyTorch forward); values match the
        # kernel because the following affine-free BN cancels it.
        return h @ params["proj_w2"] + params["proj_b2"]

    y1, y2 = proj(enc(x1)), proj(enc(x2))
    c = bn(y1).T @ bn(y2) / batch_size
    diag = jnp.diagonal(c)
    on_diag = jnp.sum((diag - 1.0) ** 2)
    off_diag = jnp.sum(c ** 2) - jnp.sum(diag ** 2)
    return on_diag + lambd * off_diag


# ------------------------------ main ------------------------------------------

if __name__ == "__main__":
    # Small, module-consistent shapes: two views of shape (B, C, H, W).
    B, C, H, W = 8, 4, 16, 16
    rep_dim, emb_dim, num_classes = 32, 128, 16
    lambd = 0.0051
    in_dim = C * H * W

    key = jax.random.PRNGKey(0)
    k_p, k_x1, k_x2 = jax.random.split(key, 3)
    params = init_params(k_p, in_dim, rep_dim, emb_dim, num_classes)
    x1 = jax.random.normal(k_x1, (B, C, H, W), jnp.float32)
    x2 = jax.random.normal(k_x2, (B, C, H, W), jnp.float32)

    loss = generative_representation_forward(params, x1, x2, B, lambd)
    loss = jax.block_until_ready(loss)

    ref = _ref_forward(params, x1, x2, B, lambd)
    assert jnp.allclose(loss, ref, rtol=1e-4, atol=1e-4), (loss, ref)

    print("KERNEL_OK")
</pallas_src>

<mosaic_0001>
module attributes {stable_mosaic.version = 11 : i64} {
  func.func @_fused_forward_kernel(%arg0: memref<8x1024xf32, #tpu.memory_space<vmem>>, %arg1: memref<8x1024xf32, #tpu.memory_space<vmem>>, %arg2: memref<1024x32xf32, #tpu.memory_space<vmem>>, %arg3: memref<32x128xf32, #tpu.memory_space<vmem>>, %arg4: memref<2x128xf32, #tpu.memory_space<vmem>>, %arg5: memref<128x128xf32, #tpu.memory_space<vmem>>, %arg6: memref<1x1xf32, #tpu.memory_space<smem>>) attributes {dimension_semantics = [], scalar_prefetch = 0 : i64, scratch_operands = 0 : i64, tpu.core_type = #tpu.core_type<tc>} {
    %c0 = arith.constant 0 : index
    %c0_0 = arith.constant 0 : index
    %0 = vector.load %arg4[%c0, %c0_0] : memref<2x128xf32, #tpu.memory_space<vmem>>, vector<1x128xf32>
    %c1 = arith.constant 1 : index
    %c0_1 = arith.constant 0 : index
    %1 = vector.load %arg4[%c1, %c0_1] : memref<2x128xf32, #tpu.memory_space<vmem>>, vector<1x128xf32>
    %c0_2 = arith.constant 0 : index
    %c0_3 = arith.constant 0 : index
    %2 = vector.load %arg0[%c0_2, %c0_3] : memref<8x1024xf32, #tpu.memory_space<vmem>>, vector<8x1024xf32>
    %c0_4 = arith.constant 0 : index
    %c0_5 = arith.constant 0 : index
    %3 = vector.load %arg2[%c0_4, %c0_5] : memref<1024x32xf32, #tpu.memory_space<vmem>>, vector<1024x32xf32>
    %cst = arith.constant dense<0.000000e+00> : vector<8x32xf32>
    %4 = tpu.matmul %2, %3, %cst {dimension_numbers = #tpu.dot_dimension_numbers<[1], [0], [0], [1], [0, 0, 1, 1], [], []>} : vector<8x1024xf32>, vector<1024x32xf32>, vector<8x32xf32> -> vector<8x32xf32>
    %c0_6 = arith.constant 0 : index
    %c0_7 = arith.constant 0 : index
    %5 = vector.load %arg3[%c0_6, %c0_7] : memref<32x128xf32, #tpu.memory_space<vmem>>, vector<32x128xf32>
    %cst_8 = arith.constant dense<0.000000e+00> : vector<8x128xf32>
    %6 = tpu.matmul %4, %5, %cst_8 {dimension_numbers = #tpu.dot_dimension_numbers<[1], [0], [0], [1], [0, 0, 1, 1], [], []>} : vector<8x32xf32>, vector<32x128xf32>, vector<8x128xf32> -> vector<8x128xf32>
    %cst_9 = arith.constant dense<0.000000e+00> : vector<128xf32>
    %7 = vector.multi_reduction <add>, %6, %cst_9 [0] : vector<8x128xf32> to vector<128xf32>
    %8 = vector.shape_cast %7 : vector<128xf32> to vector<1x128xf32>
    %9 = arith.mulf %6, %6 : vector<8x128xf32>
    %cst_10 = arith.constant dense<0.000000e+00> : vector<128xf32>
    %10 = vector.multi_reduction <add>, %9, %cst_10 [0] : vector<8x128xf32> to vector<128xf32>
    %11 = vector.shape_cast %10 : vector<128xf32> to vector<1x128xf32>
    %cst_11 = arith.constant 1.250000e-01 : f32
    %12 = vector.broadcast %cst_11 : f32 to vector<1x128xf32>
    %13 = arith.mulf %8, %12 : vector<1x128xf32>
    %cst_12 = arith.constant 1.250000e-01 : f32
    %14 = vector.broadcast %cst_12 : f32 to vector<1x128xf32>
    %15 = arith.mulf %11, %14 : vector<1x128xf32>
    %16 = arith.mulf %13, %13 : vector<1x128xf32>
    %17 = arith.subf %15, %16 : vector<1x128xf32>
    %18 = vector.broadcast %13 : vector<1x128xf32> to vector<8x128xf32>
    %19 = arith.subf %6, %18 : vector<8x128xf32>
    %cst_13 = arith.constant 9.99999974E-6 : f32
    %20 = vector.broadcast %cst_13 : f32 to vector<1x128xf32>
    %21 = arith.addf %17, %20 : vector<1x128xf32>
    %22 = math.rsqrt %21 : vector<1x128xf32>
    %23 = vector.broadcast %22 : vector<1x128xf32> to vector<8x128xf32>
    %24 = arith.mulf %19, %23 : vector<8x128xf32>
    %25 = vector.broadcast %0 : vector<1x128xf32> to vector<8x128xf32>
    %26 = arith.mulf %24, %25 : vector<8x128xf32>
    %27 = vector.broadcast %1 : vector<1x128xf32> to vector<8x128xf32>
    %28 = arith.addf %26, %27 : vector<8x128xf32>
    %cst_14 = arith.constant 0.000000e+00 : f32
    %29 = vector.broadcast %cst_14 : f32 to vector<8x128xf32>
    %30 = arith.maximumf %28, %29 : vector<8x128xf32>
    %c0_15 = arith.constant 0 : index
    %c0_16 = arith.constant 0 : index
    %31 = vector.load %arg5[%c0_15, %c0_16] : memref<128x128xf32, #tpu.memory_space<vmem>>, vector<128x128xf32>
    %cst_17 = arith.constant dense<0.000000e+00> : vector<8x128xf32>
    %32 = tpu.matmul %30, %31, %cst_17 {dimension_numbers = #tpu.dot_dimension_numbers<[1], [0], [0], [1], [0, 0, 1, 1], [], []>} : vector<8x128xf32>, vector<128x128xf32>, vector<8x128xf32> -> vector<8x128xf32>
    %cst_18 = arith.constant dense<0.000000e+00> : vector<128xf32>
    %33 = vector.multi_reduction <add>, %32, %cst_18 [0] : vector<8x128xf32> to vector<128xf32>
    %34 = vector.shape_cast %33 : vector<128xf32> to vector<1x128xf32>
    %35 = arith.mulf %32, %32 : vector<8x128xf32>
    %cst_19 = arith.constant dense<0.000000e+00> : vector<128xf32>
    %36 = vector.multi_reduction <add>, %35, %cst_19 [0] : vector<8x128xf32> to vector<128xf32>
    %37 = vector.shape_cast %36 : vector<128xf32> to vector<1x128xf32>
    %cst_20 = arith.constant 1.250000e-01 : f32
    %38 = vector.broadcast %cst_20 : f32 to vector<1x128xf32>
    %39 = arith.mulf %34, %38 : vector<1x128xf32>
    %cst_21 = arith.constant 1.250000e-01 : f32
    %40 = vector.broadcast %cst_21 : f32 to vector<1x128xf32>
    %41 = arith.mulf %37, %40 : vector<1x128xf32>
    %42 = arith.mulf %39, %39 : vector<1x128xf32>
    %43 = arith.subf %41, %42 : vector<1x128xf32>
    %44 = vector.broadcast %39 : vector<1x128xf32> to vector<8x128xf32>
    %45 = arith.subf %32, %44 : vector<8x128xf32>
    %cst_22 = arith.constant 9.99999974E-6 : f32
    %46 = vector.broadcast %cst_22 : f32 to vector<1x128xf32>
    %47 = arith.addf %43, %46 : vector<1x128xf32>
    %48 = math.rsqrt %47 : vector<1x128xf32>
    %49 = vector.broadcast %48 : vector<1x128xf32> to vector<8x128xf32>
    %50 = arith.mulf %45, %49 : vector<8x128xf32>
    %c0_23 = arith.constant 0 : index
    %c0_24 = arith.constant 0 : index
    %51 = vector.load %arg1[%c0_23, %c0_24] : memref<8x1024xf32, #tpu.memory_space<vmem>>, vector<8x1024xf32>
    %c0_25 = arith.constant 0 : index
    %c0_26 = arith.constant 0 : index
    %52 = vector.load %arg2[%c0_25, %c0_26] : memref<1024x32xf32, #tpu.memory_space<vmem>>, vector<1024x32xf32>
    %cst_27 = arith.constant dense<0.000000e+00> : vector<8x32xf32>
    %53 = tpu.matmul %51, %52, %cst_27 {dimension_numbers = #tpu.dot_dimension_numbers<[1], [0], [0], [1], [0, 0, 1, 1], [], []>} : vector<8x1024xf32>, vector<1024x32xf32>, vector<8x32xf32> -> vector<8x32xf32>
    %c0_28 = arith.constant 0 : index
    %c0_29 = arith.constant 0 : index
    %54 = vector.load %arg3[%c0_28, %c0_29] : memref<32x128xf32, #tpu.memory_space<vmem>>, vector<32x128xf32>
    %cst_30 = arith.constant dense<0.000000e+00> : vector<8x128xf32>
    %55 = tpu.matmul %53, %54, %cst_30 {dimension_numbers = #tpu.dot_dimension_numbers<[1], [0], [0], [1], [0, 0, 1, 1], [], []>} : vector<8x32xf32>, vector<32x128xf32>, vector<8x128xf32> -> vector<8x128xf32>
    %cst_31 = arith.constant dense<0.000000e+00> : vector<128xf32>
    %56 = vector.multi_reduction <add>, %55, %cst_31 [0] : vector<8x128xf32> to vector<128xf32>
    %57 = vector.shape_cast %56 : vector<128xf32> to vector<1x128xf32>
    %58 = arith.mulf %55, %55 : vector<8x128xf32>
    %cst_32 = arith.constant dense<0.000000e+00> : vector<128xf32>
    %59 = vector.multi_reduction <add>, %58, %cst_32 [0] : vector<8x128xf32> to vector<128xf32>
    %60 = vector.shape_cast %59 : vector<128xf32> to vector<1x128xf32>
    %cst_33 = arith.constant 1.250000e-01 : f32
    %61 = vector.broadcast %cst_33 : f32 to vector<1x128xf32>
    %62 = arith.mulf %57, %61 : vector<1x128xf32>
    %cst_34 = arith.constant 1.250000e-01 : f32
    %63 = vector.broadcast %cst_34 : f32 to vector<1x128xf32>
    %64 = arith.mulf %60, %63 : vector<1x128xf32>
    %65 = arith.mulf %62, %62 : vector<1x128xf32>
    %66 = arith.subf %64, %65 : vector<1x128xf32>
    %67 = vector.broadcast %62 : vector<1x128xf32> to vector<8x128xf32>
    %68 = arith.subf %55, %67 : vector<8x128xf32>
    %cst_35 = arith.constant 9.99999974E-6 : f32
    %69 = vector.broadcast %cst_35 : f32 to vector<1x128xf32>
    %70 = arith.addf %66, %69 : vector<1x128xf32>
    %71 = math.rsqrt %70 : vector<1x128xf32>
    %72 = vector.broadcast %71 : vector<1x128xf32> to vector<8x128xf32>
    %73 = arith.mulf %68, %72 : vector<8x128xf32>
    %74 = vector.broadcast %0 : vector<1x128xf32> to vector<8x128xf32>
    %75 = arith.mulf %73, %74 : vector<8x128xf32>
    %76 = vector.broadcast %1 : vector<1x128xf32> to vector<8x128xf32>
    %77 = arith.addf %75, %76 : vector<8x128xf32>
    %cst_36 = arith.constant 0.000000e+00 : f32
    %78 = vector.broadcast %cst_36 : f32 to vector<8x128xf32>
    %79 = arith.maximumf %77, %78 : vector<8x128xf32>
    %c0_37 = arith.constant 0 : index
    %c0_38 = arith.constant 0 : index
    %80 = vector.load %arg5[%c0_37, %c0_38] : memref<128x128xf32, #tpu.memory_space<vmem>>, vector<128x128xf32>
    %cst_39 = arith.constant dense<0.000000e+00> : vector<8x128xf32>
    %81 = tpu.matmul %79, %80, %cst_39 {dimension_numbers = #tpu.dot_dimension_numbers<[1], [0], [0], [1], [0, 0, 1, 1], [], []>} : vector<8x128xf32>, vector<128x128xf32>, vector<8x128xf32> -> vector<8x128xf32>
    %cst_40 = arith.constant dense<0.000000e+00> : vector<128xf32>
    %82 = vector.multi_reduction <add>, %81, %cst_40 [0] : vector<8x128xf32> to vector<128xf32>
    %83 = vector.shape_cast %82 : vector<128xf32> to vector<1x128xf32>
    %84 = arith.mulf %81, %81 : vector<8x128xf32>
    %cst_41 = arith.constant dense<0.000000e+00> : vector<128xf32>
    %85 = vector.multi_reduction <add>, %84, %cst_41 [0] : vector<8x128xf32> to vector<128xf32>
    %86 = vector.shape_cast %85 : vector<128xf32> to vector<1x128xf32>
    %cst_42 = arith.constant 1.250000e-01 : f32
    %87 = vector.broadcast %cst_42 : f32 to vector<1x128xf32>
    %88 = arith.mulf %83, %87 : vector<1x128xf32>
    %cst_43 = arith.constant 1.250000e-01 : f32
    %89 = vector.broadcast %cst_43 : f32 to vector<1x128xf32>
    %90 = arith.mulf %86, %89 : vector<1x128xf32>
    %91 = arith.mulf %88, %88 : vector<1x128xf32>
    %92 = arith.subf %90, %91 : vector<1x128xf32>
    %93 = vector.broadcast %88 : vector<1x128xf32> to vector<8x128xf32>
    %94 = arith.subf %81, %93 : vector<8x128xf32>
    %cst_44 = arith.constant 9.99999974E-6 : f32
    %95 = vector.broadcast %cst_44 : f32 to vector<1x128xf32>
    %96 = arith.addf %92, %95 : vector<1x128xf32>
    %97 = math.rsqrt %96 : vector<1x128xf32>
    %98 = vector.broadcast %97 : vector<1x128xf32> to vector<8x128xf32>
    %99 = arith.mulf %94, %98 : vector<8x128xf32>
    %100 = arith.mulf %50, %99 : vector<8x128xf32>
    %cst_45 = arith.constant dense<0.000000e+00> : vector<128xf32>
    %101 = vector.multi_reduction <add>, %100, %cst_45 [0] : vector<8x128xf32> to vector<128xf32>
    %102 = vector.shape_cast %101 : vector<128xf32> to vector<1x128xf32>
    %cst_46 = arith.constant 1.250000e-01 : f32
    %103 = vector.broadcast %cst_46 : f32 to vector<1x128xf32>
    %104 = arith.mulf %102, %103 : vector<1x128xf32>
    %cst_47 = arith.constant 1.000000e+00 : f32
    %105 = vector.broadcast %cst_47 : f32 to vector<1x128xf32>
    %106 = arith.subf %104, %105 : vector<1x128xf32>
    %107 = arith.mulf %106, %106 : vector<1x128xf32>
    %108 = vector.shape_cast %107 : vector<1x128xf32> to vector<1x1x128xf32>
    %cst_48 = arith.constant dense<0.000000e+00> : vector<1xf32>
    %109 = vector.multi_reduction <add>, %108, %cst_48 [1, 2] : vector<1x1x128xf32> to vector<1xf32>
    %110 = vector.shape_cast %109 : vector<1xf32> to vector<1x1x1xf32>
    %111 = vector.extract %110[0, 0, 0] : f32 from vector<1x1x1xf32>
    %112 = arith.mulf %104, %104 : vector<1x128xf32>
    %113 = vector.shape_cast %112 : vector<1x128xf32> to vector<1x1x128xf32>
    %cst_49 = arith.constant dense<0.000000e+00> : vector<1xf32>
    %114 = vector.multi_reduction <add>, %113, %cst_49 [1, 2] : vector<1x1x128xf32> to vector<1xf32>
    %115 = vector.shape_cast %114 : vector<1xf32> to vector<1x1x1xf32>
    %116 = vector.extract %115[0, 0, 0] : f32 from vector<1x1x1xf32>
    %cst_50 = arith.constant dense<0.000000e+00> : vector<8x8xf32>
    %117 = tpu.matmul %50, %50, %cst_50 {dimension_numbers = #tpu.dot_dimension_numbers<[1], [1], [0], [0], [0, 0, 1, 0], [], []>} : vector<8x128xf32>, vector<8x128xf32>, vector<8x8xf32> -> vector<8x8xf32>
    %cst_51 = arith.constant dense<0.000000e+00> : vector<8x8xf32>
    %118 = tpu.matmul %99, %99, %cst_51 {dimension_numbers = #tpu.dot_dimension_numbers<[1], [1], [0], [0], [0, 0, 1, 0], [], []>} : vector<8x128xf32>, vector<8x128xf32>, vector<8x8xf32> -> vector<8x8xf32>
    %119 = arith.mulf %117, %118 : vector<8x8xf32>
    %120 = vector.shape_cast %119 : vector<8x8xf32> to vector<1x8x8xf32>
    %cst_52 = arith.constant dense<0.000000e+00> : vector<1xf32>
    %121 = vector.multi_reduction <add>, %120, %cst_52 [1, 2] : vector<1x8x8xf32> to vector<1xf32>
    %122 = vector.shape_cast %121 : vector<1xf32> to vector<1x1x1xf32>
    %123 = vector.extract %122[0, 0, 0] : f32 from vector<1x1x1xf32>
    %cst_53 = arith.constant 1.562500e-02 : f32
    %124 = arith.mulf %123, %cst_53 : f32
    %125 = arith.subf %124, %116 : f32
    %cst_54 = arith.constant 5.100000e-03 : f32
    %126 = arith.mulf %cst_54, %125 : f32
    %127 = arith.addf %111, %126 : f32
    %c0_55 = arith.constant 0 : index
    %c0_56 = arith.constant 0 : index
    %128 = memref.load %arg6[%c0_55, %c0_56] : memref<1x1xf32, #tpu.memory_space<smem>>
    memref.store %127, %arg6[%c0_55, %c0_56] : memref<1x1xf32, #tpu.memory_space<smem>>
    return
  }
}

</mosaic_0001>

<bundles_post_ra>
// kernel: tpu_custom_call.1
= control target key start
LH: loop header
LB: loop body
LE: loop exit
PB: predicated region body
PF: predicated region fallthrough
CT: control target
= control target key end

     0   :  { %s2008_s0 = inlined_call_operand.vmem [shape: f32[8,1024], index: 0, kind: input, shape index: {}]   ;;  %s2009_s1 = inlined_call_operand.vmem [shape: f32[8,1024], index: 1, kind: input, shape index: {}]   ;;  %s2010_s2 = inlined_call_operand.vmem [shape: f32[1024,32], index: 2, kind: input, shape index: {}]   ;;  %s2011_s3 = inlined_call_operand.vmem [shape: f32[32,128], index: 3, kind: input, shape index: {}]   ;;  %s2012_s4 = inlined_call_operand.vmem [shape: f32[2,128], index: 4, kind: input, shape index: {}]   ;;  %s2013_s5 = inlined_call_operand.vmem [shape: f32[128,128], index: 5, kind: input, shape index: {}]   ;;  %s2014_s6 = inlined_call_operand.hbm [shape: f32[1,1], index: 6, kind: output, shape index: {}]  }
   0x1   :  { %v903_v0 = vld [vmem:[%s2010_s2 + $0x78] sm:$0xff]  ;;  %v913_v2 = vld [vmem:[%s2010_s2 + $0x70] sm:$0xff]  ;;  %v937_v6 = vld [vmem:[%s2010_s2 + $0x68] sm:$0xff] }
   0x2   :  { %v908_v1 = vld [vmem:[%s2010_s2 + $0x178] sm:$0xff]  ;;  %162 = vmatpush.msra.mxu0 %v903_v0  ;;  %v925_v4 = vld [vmem:[%s2010_s2 + $0x170] sm:$0xff]  ;;  %v947_v8 = vld [vmem:[%s2010_s2 + $0x168] sm:$0xff] }
   0x3   :  { %2083 = vst [vmem:[#allocation5_spill] sm:$0xff] %v908_v1  ;;  %202 = vmatpush.msra.mxu2 %v908_v1  ;;  %v920_v3 = vld [vmem:[%s2010_s2 + $0xf8] sm:$0xff]  ;;  %v942_v7 = vld [vmem:[%s2010_s2 + $0xf0] sm:$0xff]  ;;  %v959_v10 = vld [vmem:[%s2010_s2 + $0xe8] sm:$0xff] }
   0x4   :  { %2084 = vst [vmem:[#allocation6_spill] sm:$0xff] %v925_v4  ;;  %v930_v5 = vld [vmem:[%s2010_s2 + $0x1f8] sm:$0xff]  ;;  %182 = vmatpush.msra.mxu1 %v920_v3  ;;  %163 = vmatpush.msra.mxu0 %v913_v2  ;;  %v954_v9 = vld [vmem:[%s2010_s2 + $0x1f0] sm:$0xff]  ;;  %v966_v11 = vld [vmem:[%s2010_s2 + $0x60] sm:$0xff] }
   0x5   :  { %2085 = vst [vmem:[#allocation7_spill] sm:$0xff] %v930_v5  ;;  %222 = vmatpush.msra.mxu3 %v930_v5  ;;  %203 = vmatpush.msra.mxu2 %v925_v4  ;;  %v971_v12 = vld [vmem:[%s2010_s2 + $0x160] sm:$0xff]  ;;  %v976_v13 = vld [vmem:[%s2010_s2 + $0x1e8] sm:$0xff]  ;;  %v995_v16 = vld [vmem:[%s2010_s2 + $0x58] sm:$0xff] }
   0x6   :  { %2086 = vst [vmem:[#allocation8_spill] sm:$0xff] %v947_v8  ;;  %183 = vmatpush.msra.mxu1 %v942_v7  ;;  %164 = vmatpush.msra.mxu0 %v937_v6  ;;  %v983_v14 = vld [vmem:[%s2010_s2 + $0xe0] sm:$0xff]  ;;  %v1000_v17 = vld [vmem:[%s2010_s2 + $0x158] sm:$0xff]  ;;  %v1019_v20 = vld [vmem:[%s2010_s2 + $0x50] sm:$0xff] }
   0x7   :  { %2087 = vst [vmem:[#allocation9_spill] sm:$0xff] %v954_v9  ;;  %223 = vmatpush.msra.mxu3 %v954_v9  ;;  %204 = vmatpush.msra.mxu2 %v947_v8  ;;  %v988_v15 = vld [vmem:[%s2010_s2 + $0x1e0] sm:$0xff]  ;;  %v1007_v18 = vld [vmem:[%s2010_s2 + $0xd8] sm:$0xff]  ;;  %v1024_v21 = vld [vmem:[%s2010_s2 + $0x150] sm:$0xff] }
   0x8   :  { %2088 = vst [vmem:[#allocation10_spill] sm:$0xff] %v971_v12  ;;  %184 = vmatpush.msra.mxu1 %v959_v10  ;;  %165 = vmatpush.msra.mxu0 %v966_v11  ;;  %v1012_v19 = vld [vmem:[%s2010_s2 + $0x1d8] sm:$0xff]  ;;  %v1031_v22 = vld [vmem:[%s2010_s2 + $0xd0] sm:$0xff]  ;;  %v1043_v24 = vld [vmem:[%s2010_s2 + $0x48] sm:$0xff] }
   0x9   :  { %2089 = vst [vmem:[#allocation11_spill] sm:$0xff] %v976_v13  ;;  %224 = vmatpush.msra.mxu3 %v976_v13  ;;  %205 = vmatpush.msra.mxu2 %v971_v12  ;;  %v1036_v23 = vld [vmem:[%s2010_s2 + $0x1d0] sm:$0xff]  ;;  %v1048_v25 = vld [vmem:[%s2010_s2 + $0x148] sm:$0xff]  ;;  %v1067_v28 = vld [vmem:[%s2010_s2 + $0x40] sm:$0xff] }
   0xa   :  { %2090 = vst [vmem:[#allocation12_spill] sm:$0xff] %v988_v15  ;;  %185 = vmatpush.msra.mxu1 %v983_v14  ;;  %166 = vmatpush.msra.mxu0 %v995_v16  ;;  %v1055_v26 = vld [vmem:[%s2010_s2 + $0xc8] sm:$0xff]  ;;  %v1072_v29 = vld [vmem:[%s2010_s2 + $0x140] sm:$0xff]  ;;  %v1091_v32 = vld [vmem:[%s2010_s2 + $0x38] sm:$0xff] }
   0xb   :  { %2091 = vst [vmem:[#allocation13_spill] sm:$0xff] %v1000_v17  ;;  %225 = vmatpush.msra.mxu3 %v988_v15  ;;  %206 = vmatpush.msra.mxu2 %v1000_v17  ;;  %v1060_v27 = vld [vmem:[%s2010_s2 + $0x1c8] sm:$0xff]  ;;  %v1079_v30 = vld [vmem:[%s2010_s2 + $0xc0] sm:$0xff]  ;;  %v1096_v33 = vld [vmem:[%s2010_s2 + $0x138] sm:$0xff] }
   0xc   :  { %2092 = vst [vmem:[#allocation14_spill] sm:$0xff] %v1012_v19  ;;  %186 = vmatpush.msra.mxu1 %v1007_v18  ;;  %167 = vmatpush.msra.mxu0 %v1019_v20  ;;  %v1084_v31 = vld [vmem:[%s2010_s2 + $0x1c0] sm:$0xff]  ;;  %v1103_v34 = vld [vmem:[%s2010_s2 + $0xb8] sm:$0xff]  ;;  %v1115_v36 = vld [vmem:[%s2010_s2 + $0x30] sm:$0xff] }
   0xd   :  { %2093 = vst [vmem:[#allocation15_spill] sm:$0xff] %v1024_v21  ;;  %226 = vmatpush.msra.mxu3 %v1012_v19  ;;  %207 = vmatpush.msra.mxu2 %v1024_v21  ;;  %v1108_v35 = vld [vmem:[%s2010_s2 + $0x1b8] sm:$0xff]  ;;  %v1120_v37 = vld [vmem:[%s2010_s2 + $0x130] sm:$0xff]  ;;  %v1139_v40 = vld [vmem:[%s2010_s2 + $0x28] sm:$0xff] }
   0xe   :  { %2094 = vst [vmem:[#allocation16_spill] sm:$0xff] %v1036_v23  ;;  %187 = vmatpush.msra.mxu1 %v1031_v22  ;;  %168 = vmatpush.msra.mxu0 %v1043_v24  ;;  %v1127_v38 = vld [vmem:[%s2010_s2 + $0xb0] sm:$0xff]  ;;  %v1144_v41 = vld [vmem:[%s2010_s2 + $0x128] sm:$0xff]  ;;  %v1163_v44 = vld [vmem:[%s2010_s2 + $0x20] sm:$0xff] }
   0xf   :  { %2095 = vst [vmem:[#allocation17_spill] sm:$0xff] %v1048_v25  ;;  %227 = vmatpush.msra.mxu3 %v1036_v23  ;;  %208 = vmatpush.msra.mxu2 %v1048_v25  ;;  %v1132_v39 = vld [vmem:[%s2010_s2 + $0x1b0] sm:$0xff]  ;;  %v1151_v42 = vld [vmem:[%s2010_s2 + $0xa8] sm:$0xff]  ;;  %v1168_v45 = vld [vmem:[%s2010_s2 + $0x120] sm:$0xff] }
  0x10   :  { %2096 = vst [vmem:[#allocation18_spill] sm:$0xff] %v1060_v27  ;;  %188 = vmatpush.msra.mxu1 %v1055_v26  ;;  %169 = vmatpush.msra.mxu0 %v1067_v28  ;;  %v1156_v43 = vld [vmem:[%s2010_s2 + $0x1a8] sm:$0xff]  ;;  %v1175_v46 = vld [vmem:[%s2010_s2 + $0xa0] sm:$0xff]  ;;  %v1187_v48 = vld [vmem:[%s2010_s2 + $0x18] sm:$0xff] }
  0x11   :  { %2097 = vst [vmem:[#allocation19_spill] sm:$0xff] %v1072_v29  ;;  %228 = vmatpush.msra.mxu3 %v1060_v27  ;;  %209 = vmatpush.msra.mxu2 %v1072_v29  ;;  %v1180_v47 = vld [vmem:[%s2010_s2 + $0x1a0] sm:$0xff]  ;;  %v1192_v49 = vld [vmem:[%s2010_s2 + $0x118] sm:$0xff]  ;;  %v1211_v52 = vld [vmem:[%s2010_s2 + $0x10] sm:$0xff] }
  0x12   :  { %2098 = vst [vmem:[#allocation20_spill] sm:$0xff] %v1084_v31  ;;  %189 = vmatpush.msra.mxu1 %v1079_v30  ;;  %170 = vmatpush.msra.mxu0 %v1091_v32  ;;  %v1199_v50 = vld [vmem:[%s2010_s2 + $0x98] sm:$0xff]  ;;  %v1216_v53 = vld [vmem:[%s2010_s2 + $0x110] sm:$0xff]  ;;  %v1235_v56 = vld [vmem:[%s2010_s2 + $0x8] sm:$0xff] }
  0x13   :  { %2099 = vst [vmem:[#allocation21_spill] sm:$0xff] %v1096_v33  ;;  %229 = vmatpush.msra.mxu3 %v1084_v31  ;;  %210 = vmatpush.msra.mxu2 %v1096_v33  ;;  %v1204_v51 = vld [vmem:[%s2010_s2 + $0x198] sm:$0xff]  ;;  %v1223_v54 = vld [vmem:[%s2010_s2 + $0x90] sm:$0xff]  ;;  %v1240_v57 = vld [vmem:[%s2010_s2 + $0x108] sm:$0xff] }
  0x14   :  { %2100 = vst [vmem:[#allocation22_spill] sm:$0xff] %v1108_v35  ;;  %190 = vmatpush.msra.mxu1 %v1103_v34  ;;  %171 = vmatpush.msra.mxu0 %v1115_v36  ;;  %v1228_v55 = vld [vmem:[%s2010_s2 + $0x190] sm:$0xff]  ;;  %v1247_v58 = vld [vmem:[%s2010_s2 + $0x88] sm:$0xff]  ;;  %v1259_v60 = vld [vmem:[%s2010_s2] sm:$0xff] }
  0x15   :  { %2101 = vst [vmem:[#allocation23_spill] sm:$0xff] %v1120_v37  ;;  %230 = vmatpush.msra.mxu3 %v1108_v35  ;;  %211 = vmatpush.msra.mxu2 %v1120_v37  ;;  %v1252_v59 = vld [vmem:[%s2010_s2 + $0x188] sm:$0xff]  ;;  %v1264_v61 = vld [vmem:[%s2010_s2 + $0x100] sm:$0xff]  ;;  %v1271_v62 = vld [vmem:[%s2010_s2 + $0x278] sm:$0xff] }
  0x16   :  { %2102 = vst [vmem:[#allocation24_spill] sm:$0xff] %v1132_v39  ;;  %191 = vmatpush.msra.mxu1 %v1127_v38  ;;  %172 = vmatpush.msra.mxu0 %v1139_v40  ;;  %v1276_v63 = vld [vmem:[%s2010_s2 + $0x378] sm:$0xff]  ;;  %v1319_v35 = vld [vmem:[%s2010_s2 + $0x268] sm:$0xff]  ;;  %v1324_v31 = vld [vmem:[%s2010_s2 + $0x2f0] sm:$0xff] }
  0x17   :  { %2103 = vst [vmem:[#allocation25_spill] sm:$0xff] %v1144_v41  ;;  %231 = vmatpush.msra.mxu3 %v1132_v39  ;;  %212 = vmatpush.msra.mxu2 %v1144_v41  ;;  %v1312_v39 = vld [vmem:[%s2010_s2 + $0x3f8] sm:$0xff]  ;;  %v1331_v27 = vld [vmem:[%s2010_s2 + $0x368] sm:$0xff]  ;;  %v1343_v23 = vld [vmem:[%s2010_s2 + $0x260] sm:$0xff] }
  0x18   :  { %2104 = vst [vmem:[#allocation26_spill] sm:$0xff] %v1156_v43  ;;  %192 = vmatpush.msra.mxu1 %v1151_v42  ;;  %173 = vmatpush.msra.mxu0 %v1163_v44  ;;  %v1348_v19 = vld [vmem:[%s2010_s2 + $0x2e8] sm:$0xff]  ;;  %v1355_v15 = vld [vmem:[%s2010_s2 + $0x360] sm:$0xff]  ;;  %v1367_v13 = vld [vmem:[%s2010_s2 + $0x258] sm:$0xff] }
  0x19   :  { %2105 = vst [vmem:[#allocation27_spill] sm:$0xff] %v1168_v45  ;;  %232 = vmatpush.msra.mxu3 %v1156_v43  ;;  %213 = vmatpush.msra.mxu2 %v1168_v45  ;;  %v1307_v43 = vld [vmem:[%s2010_s2 + $0x370] sm:$0xff]  ;;  %v1372_v9 = vld [vmem:[%s2010_s2 + $0x2e0] sm:$0xff]  ;;  %v1379_v5 = vld [vmem:[%s2010_s2 + $0x358] sm:$0xff] }
  0x1a   :  { %2106 = vst [vmem:[#allocation28_spill] sm:$0xff] %v1180_v47  ;;  %193 = vmatpush.msra.mxu1 %v1175_v46  ;;  %174 = vmatpush.msra.mxu0 %v1187_v48  ;;  %v1468_v45 = vld [vmem:[%s2010_s2 + $0x2c0] sm:$0xff]  ;;  %v1475_v41 = vld [vmem:[%s2010_s2 + $0x338] sm:$0xff] }
  0x1b   :  { %2107 = vst [vmem:[#allocation29_spill] sm:$0xff] %v1192_v49  ;;  %233 = vmatpush.msra.mxu3 %v1180_v47  ;;  %214 = vmatpush.msra.mxu2 %v1192_v49  ;;  %v1295_v47 = vld [vmem:[%s2010_s2 + $0x270] sm:$0xff]  ;;  %v1461_v49 = vld [vmem:[%s2010_s2 + $0x238] sm:$0xff] }
  0x1c   :  { %2108 = vst [vmem:[#allocation30_spill] sm:$0xff] %v1204_v51  ;;  %194 = vmatpush.msra.mxu1 %v1199_v50  ;;  %175 = vmatpush.msra.mxu0 %v1211_v52 }
  0x1d   :  { %2109 = vst [vmem:[#allocation31_spill] sm:$0xff] %v1216_v53  ;;  %234 = vmatpush.msra.mxu3 %v1204_v51  ;;  %215 = vmatpush.msra.mxu2 %v1216_v53  ;;  %v1288_v51 = vld [vmem:[%s2010_s2 + $0x180] sm:$0xff]  ;;  %v1444_v53 = vld [vmem:[%s2010_s2 + $0x2c8] sm:$0xff] }
  0x1e   :  { %2110 = vst [vmem:[#allocation32_spill] sm:$0xff] %v1228_v55  ;;  %195 = vmatpush.msra.mxu1 %v1223_v54  ;;  %176 = vmatpush.msra.mxu0 %v1235_v56 }
  0x1f   :  { %2111 = vst [vmem:[#allocation33_spill] sm:$0xff] %v1240_v57  ;;  %235 = vmatpush.msra.mxu3 %v1228_v55  ;;  %216 = vmatpush.msra.mxu2 %v1240_v57  ;;  %v1283_v55 = vld [vmem:[%s2010_s2 + $0x80] sm:$0xff] }
  0x20   :  { %2112 = vst [vmem:[#allocation34_spill] sm:$0xff] %v1252_v59  ;;  %196 = vmatpush.msra.mxu1 %v1247_v58  ;;  %177 = vmatpush.msra.mxu0 %v1259_v60  ;;  %v1439_v57 = vld [vmem:[%s2010_s2 + $0x240] sm:$0xff] }
  0x21   :  { %2113 = vst [vmem:[#allocation35_spill] sm:$0xff] %v1264_v61  ;;  %236 = vmatpush.msra.mxu3 %v1252_v59  ;;  %217 = vmatpush.msra.mxu2 %v1264_v61  ;;  %v1300_v59 = vld [vmem:[%s2010_s2 + $0x2f8] sm:$0xff]  ;;  %v1420_v61 = vld [vmem:[%s2010_s2 + $0x2d0] sm:$0xff] }
  0x22   :  { %2114 = vst [vmem:[#allocation36_spill] sm:$0xff] %v1276_v63  ;;  %242 = vmatpush.msrb.mxu0 %v1271_v62  ;;  %197 = vmatpush.msra.mxu1 %v1283_v55 }
  0x23   :  { %2115 = vst [vmem:[#allocation37_spill] sm:$0xff] %v1288_v51  ;;  %282 = vmatpush.msrb.mxu2 %v1276_v63  ;;  %237 = vmatpush.msra.mxu3 %v1288_v51  ;;  %v1336_v51 = vld [vmem:[%s2010_s2 + $0x3f0] sm:$0xff]  ;;  %v1415_v63 = vld [vmem:[%s2010_s2 + $0x248] sm:$0xff] }
  0x24   :  { %2116 = vst [vmem:[#allocation38_spill] sm:$0xff] %v1307_v43  ;;  %243 = vmatpush.msrb.mxu0 %v1295_v47  ;;  %262 = vmatpush.msrb.mxu1 %v1300_v59 }
  0x25   :  { %2117 = vst [vmem:[#allocation39_spill] sm:$0xff] %v1312_v39  ;;  %283 = vmatpush.msrb.mxu2 %v1307_v43  ;;  %302 = vmatpush.msrb.mxu3 %v1312_v39  ;;  %v1360_v39 = vld [vmem:[%s2010_s2 + $0x3e8] sm:$0xff]  ;;  %v1396_v43 = vld [vmem:[%s2010_s2 + $0x2d8] sm:$0xff] }
  0x26   :  { %2118 = vst [vmem:[#allocation40_spill] sm:$0xff] %v1331_v27  ;;  %244 = vmatpush.msrb.mxu0 %v1319_v35  ;;  %263 = vmatpush.msrb.mxu1 %v1324_v31 }
  0x27   :  { %2119 = vst [vmem:[#allocation41_spill] sm:$0xff] %v1336_v51  ;;  %284 = vmatpush.msrb.mxu2 %v1331_v27  ;;  %303 = vmatpush.msrb.mxu3 %v1336_v51  ;;  %v1384_v51 = vld [vmem:[%s2010_s2 + $0x3e0] sm:$0xff]  ;;  %v1391_v27 = vld [vmem:[%s2010_s2 + $0x250] sm:$0xff] }
  0x28   :  { %2120 = vst [vmem:[#allocation42_spill] sm:$0xff] %v1355_v15  ;;  %245 = vmatpush.msrb.mxu0 %v1343_v23  ;;  %264 = vmatpush.msrb.mxu1 %v1348_v19 }
  0x29   :  { %2121 = vst [vmem:[#allocation43_spill] sm:$0xff] %v1360_v39  ;;  %285 = vmatpush.msrb.mxu2 %v1355_v15  ;;  %304 = vmatpush.msrb.mxu3 %v1360_v39  ;;  %v1403_v15 = vld [vmem:[%s2010_s2 + $0x350] sm:$0xff]  ;;  %v1408_v39 = vld [vmem:[%s2010_s2 + $0x3d8] sm:$0xff] }
  0x2a   :  { %2122 = vst [vmem:[#allocation44_spill] sm:$0xff] %v1379_v5  ;;  %246 = vmatpush.msrb.mxu0 %v1367_v13  ;;  %265 = vmatpush.msrb.mxu1 %v1372_v9 }
  0x2b   :  { %2123 = vst [vmem:[#allocation45_spill] sm:$0xff] %v1384_v51  ;;  %286 = vmatpush.msrb.mxu2 %v1379_v5  ;;  %305 = vmatpush.msrb.mxu3 %v1384_v51  ;;  %v1427_v5 = vld [vmem:[%s2010_s2 + $0x348] sm:$0xff]  ;;  %v1432_v51 = vld [vmem:[%s2010_s2 + $0x3d0] sm:$0xff] }
  0x2c   :  { %2124 = vst [vmem:[#allocation46_spill] sm:$0xff] %v1403_v15  ;;  %247 = vmatpush.msrb.mxu0 %v1391_v27  ;;  %266 = vmatpush.msrb.mxu1 %v1396_v43 }
  0x2d   :  { %2125 = vst [vmem:[#allocation47_spill] sm:$0xff] %v1408_v39  ;;  %287 = vmatpush.msrb.mxu2 %v1403_v15  ;;  %306 = vmatpush.msrb.mxu3 %v1408_v39  ;;  %v1451_v15 = vld [vmem:[%s2010_s2 + $0x340] sm:$0xff]  ;;  %v1456_v39 = vld [vmem:[%s2010_s2 + $0x3c8] sm:$0xff] }
  0x2e   :  { %2126 = vst [vmem:[#allocation48_spill] sm:$0xff] %v1427_v5  ;;  %248 = vmatpush.msrb.mxu0 %v1415_v63  ;;  %267 = vmatpush.msrb.mxu1 %v1420_v61 }
  0x2f   :  { %2127 = vst [vmem:[#allocation49_spill] sm:$0xff] %v1432_v51  ;;  %288 = vmatpush.msrb.mxu2 %v1427_v5  ;;  %307 = vmatpush.msrb.mxu3 %v1432_v51  ;;  %v1480_v5 = vld [vmem:[%s2010_s2 + $0x3c0] sm:$0xff] }
  0x30   :  { %2128 = vst [vmem:[#allocation50_spill] sm:$0xff] %v1451_v15  ;;  %249 = vmatpush.msrb.mxu0 %v1439_v57  ;;  %268 = vmatpush.msrb.mxu1 %v1444_v53 }
  0x31   :  { %2129 = vst [vmem:[#allocation51_spill] sm:$0xff] %v1456_v39 }
  0x32   :  { %2130 = vst [vmem:[#allocation52_spill] sm:$0xff] %v1475_v41 }
  0x33   :  { %2131 = vst [vmem:[#allocation53_spill] sm:$0xff] %v1480_v5 }
  0x34   :  { %11 = vsyncpa [#allocation3], 0  ;;  %289 = vmatpush.msrb.mxu2 %v1451_v15  ;;  %308 = vmatpush.msrb.mxu3 %v1456_v39  ;;  %v1487_v51 = vld [vmem:[%s2010_s2 + $0x230] sm:$0xff]  ;;  %v1492_v37 = vld [vmem:[%s2010_s2 + $0x2b8] sm:$0xff]  ;;  %vm326_vm0 = vcmask 261120   ;;  %vm735_vm13 = vcmask 1040384  }
  0x35   :  { %250 = vmatpush.msrb.mxu0 %v1461_v49  ;;  %269 = vmatpush.msrb.mxu1 %v1468_v45  ;;  %v1499_v15 = vld [vmem:[%s2010_s2 + $0x330] sm:$0xff]  ;;  %v1504_v39 = vld [vmem:[%s2010_s2 + $0x3b8] sm:$0xff]  ;;  %v1511_v33 = vld [vmem:[%s2010_s2 + $0x228] sm:$0xff]  ;;  %vm798_vm14 = vcmask 64512   ;;  %s820_s13 = sshll.u32 %s2014_s6, 4  ;;  %s821_s13 = int_to_ptr.hbm [resolvable:$true] %s820_s13 }
  0x36   :  { %2132 = vst [vmem:[#allocation54_spill] sm:$0xff] %v1499_v15  ;;  %290 = vmatpush.msrb.mxu2 %v1475_v41  ;;  %309 = vmatpush.msrb.mxu3 %v1480_v5  ;;  %v1516_v29 = vld [vmem:[%s2010_s2 + $0x2b0] sm:$0xff]  ;;  %v1523_v41 = vld [vmem:[%s2010_s2 + $0x328] sm:$0xff]  ;;  %v1538_v21 = vld [vmem:[%s2010_s2 + $0x220] sm:$0xff] }
  0x37   :  { %2133 = vst [vmem:[#allocation55_spill] sm:$0xff] %v1504_v39  ;;  %251 = vmatpush.msrb.mxu0 %v1487_v51  ;;  %270 = vmatpush.msrb.mxu1 %v1492_v37  ;;  %v1528_v5 = vld [vmem:[%s2010_s2 + $0x3b0] sm:$0xff]  ;;  %v1545_v17 = vld [vmem:[%s2010_s2 + $0x2a8] sm:$0xff]  ;;  %v26_v12 = vld [vmem:[%s2008_s0] sm:$0xff] }
  0x38   :  { %2134 = vst [vmem:[#allocation56_spill] sm:$0xff] %v1523_v41  ;;  %291 = vmatpush.msrb.mxu2 %v1499_v15  ;;  %310 = vmatpush.msrb.mxu3 %v1504_v39  ;;  %v28_v25 = vld [vmem:[%s2008_s0 + $0x10] sm:$0xff]  ;;  %v1550_v39 = vld [vmem:[%s2010_s2 + $0x320] sm:$0xff]  ;;  %v1557_v15 = vld [vmem:[%s2010_s2 + $0x3a8] sm:$0xff] }
  0x39   :  { %2135 = vst [vmem:[#allocation57_spill] sm:$0xff] %v1528_v5  ;;  %252 = vmatpush.msrb.mxu0 %v1511_v33  ;;  %271 = vmatpush.msrb.mxu1 %v1516_v29  ;;  %v29_v8 = vld [vmem:[%s2008_s0 + $0x18] sm:$0xff]  ;;  %v1587_v4 = vld [vmem:[%s2010_s2 + $0x3a0] sm:$0xff]  ;;  %v1596_v1 = vld [vmem:[%s2010_s2 + $0x210] sm:$0xff] }
  0x3a   :  { %2136 = vst [vmem:[#allocation58_spill] sm:$0xff] %v1550_v39  ;;  %292 = vmatpush.msrb.mxu2 %v1523_v41  ;;  %311 = vmatpush.msrb.mxu3 %v1528_v5  ;;  %v1569_v5 = vld [vmem:[%s2010_s2 + $0x218] sm:$0xff]  ;;  %v1576_v41 = vld [vmem:[%s2010_s2 + $0x2a0] sm:$0xff] }
  0x3b   :  { %2137 = vst [vmem:[#allocation59_spill] sm:$0xff] %v1557_v15  ;;  %218 = vmatmul.f32.vlgmr.msra.gmra.mxu2 %v28_v25  ;;  %253 = vmatpush.msrb.mxu0 %v1538_v21  ;;  %v1581_v25 = vld [vmem:[%s2010_s2 + $0x318] sm:$0xff] }
  0x3c   :  { %2138 = vst [vmem:[#allocation60_spill] sm:$0xff] %v1569_v5  ;;  %272 = vmatpush.msrb.mxu1 %v1545_v17  ;;  %293 = vmatpush.msrb.mxu2 %v1550_v39  ;;  %v27_v39 = vld [vmem:[%s2008_s0 + $0x8] sm:$0xff] }
  0x3d   :  { %2139 = vst [vmem:[#allocation61_spill] sm:$0xff] %v1576_v41  ;;  %312 = vmatpush.msrb.mxu3 %v1557_v15  ;;  %178 = vmatmul.f32.vlgmr.msra.gmra.mxu0 %v26_v12  ;;  %v1601_v12 = vld [vmem:[%s2010_s2 + $0x298] sm:$0xff] }
  0x3e   :  { %2140 = vst [vmem:[#allocation62_spill] sm:$0xff] %v1581_v25  ;;  %238 = vmatmul.f32.vlgmr.msra.gmra.mxu3 %v29_v8  ;;  %254 = vmatpush.msrb.mxu0 %v1569_v5  ;;  %v1608_v8 = vld [vmem:[%s2010_s2 + $0x310] sm:$0xff]  ;;  %v1613_v15 = vld [vmem:[%s2010_s2 + $0x398] sm:$0xff]  ;;  %v1619_v5 = vld [vmem:[%s2010_s2 + $0x208] sm:$0xff] }
  0x3f   :  { %2141 = vst [vmem:[#allocation63_spill] sm:$0xff] %v1587_v4  ;;  %273 = vmatpush.msrb.mxu1 %v1576_v41  ;;  %294 = vmatpush.msrb.mxu2 %v1581_v25  ;;  %v1624_v25 = vld [vmem:[%s2010_s2 + $0x290] sm:$0xff]  ;;  %v1631_v41 = vld [vmem:[%s2010_s2 + $0x308] sm:$0xff] }
  0x40   :  { %2142 = vst [vmem:[#allocation64_spill] sm:$0xff] %v1596_v1  ;;  %313 = vmatpush.msrb.mxu3 %v1587_v4  ;;  %198 = vmatmul.f32.vlgmr.msra.gmra.mxu1 %v27_v39  ;;  %v1636_v39 = vld [vmem:[%s2010_s2 + $0x390] sm:$0xff]  ;;  %v1643_v4 = vld [vmem:[%s2010_s2 + $0x200] sm:$0xff] }
  0x41   :  { %2143 = vst [vmem:[#allocation65_spill] sm:$0xff] %v1601_v12  ;;  %255 = vmatpush.msrb.mxu0 %v1596_v1  ;;  %274 = vmatpush.msrb.mxu1 %v1601_v12  ;;  %v1648_v1 = vld [vmem:[%s2010_s2 + $0x288] sm:$0xff]  ;;  %v1675_v12 = vld [vmem:[%s2010_s2 + $0x280] sm:$0xff] }
  0x42   :  { %2144 = vst [vmem:[#allocation66_spill] sm:$0xff] %v1608_v8  ;;  %295 = vmatpush.msrb.mxu2 %v1608_v8  ;;  %314 = vmatpush.msrb.mxu3 %v1613_v15  ;;  %v1655_v8 = vld [vmem:[%s2010_s2 + $0x300] sm:$0xff] }
  0x43   :  { %2145 = vst [vmem:[#allocation67_spill] sm:$0xff] %v1613_v15  ;;  %256 = vmatpush.msrb.mxu0 %v1619_v5  ;;  %275 = vmatpush.msrb.mxu1 %v1624_v25  ;;  %v1660_v15 = vld [vmem:[%s2010_s2 + $0x388] sm:$0xff] }
  0x44   :  { %2146 = vst [vmem:[#allocation68_spill] sm:$0xff] %v1619_v5  ;;  %296 = vmatpush.msrb.mxu2 %v1631_v41  ;;  %315 = vmatpush.msrb.mxu3 %v1636_v39  ;;  %v30_v5 = vld [vmem:[%s2008_s0 + $0x20] sm:$0xff] }
  0x45   :  { %2147 = vst [vmem:[#allocation69_spill] sm:$0xff] %v1624_v25  ;;  %v32_v25 = vld [vmem:[%s2008_s0 + $0x30] sm:$0xff]  ;;  %257 = vmatpush.msrb.mxu0 %v1643_v4  ;;  %276 = vmatpush.msrb.mxu1 %v1648_v1 }
  0x46   :  { %2148 = vst [vmem:[#allocation70_spill] sm:$0xff] %v1631_v41  ;;  %297 = vmatpush.msrb.mxu2 %v1655_v8  ;;  %316 = vmatpush.msrb.mxu3 %v1660_v15  ;;  %v31_v41 = vld [vmem:[%s2008_s0 + $0x28] sm:$0xff] }
  0x47   :  { %2149 = vst [vmem:[#allocation71_spill] sm:$0xff] %v1636_v39  ;;  %v1680_v39 = vld [vmem:[%s2010_s2 + $0x380] sm:$0xff]  ;;  %258 = vmatmul.f32.vlgmr.msrb.gmra.mxu0 %v30_v5  ;;  %298 = vmatmul.f32.vlgmr.msrb.gmra.mxu2 %v32_v25  ;;  %v2183_v25 = vld [vmem:[#allocation54_spill] sm:$0xff] }
  0x48   :  { %2150 = vst [vmem:[#allocation72_spill] sm:$0xff] %v1643_v4  ;;  %v33_v4 = vld [vmem:[%s2008_s0 + $0x38] sm:$0xff]  ;;  %277 = vmatpush.msrb.mxu1 %v1675_v12  ;;  %317 = vmatpush.msrb.mxu3 %v1680_v39 }
  0x49   :  { %278 = vmatmul.f32.vlgmr.msrb.gmra.mxu1 %v31_v41  ;;  %318 = vmatmul.f32.vlgmr.msrb.gmra.mxu3 %v33_v4  ;;  %v2154_v4 = vld [vmem:[#allocation64_spill] sm:$0xff]  ;;  %v2168_v41 = vld [vmem:[#allocation25_spill] sm:$0xff] }
  0x4a   :  { %459 = vmatpush.msra.mxu2 %v903_v0  ;;  %479 = vmatpush.msra.mxu3 %v920_v3  ;;  %v2151_v0 = vld [vmem:[#allocation61_spill] sm:$0xff] }
  0x4b   :  { %v2153_v3 = vld [vmem:[#allocation65_spill] sm:$0xff] }
  0x4c   :  { %460 = vmatpush.msra.mxu2 %v913_v2  ;;  %480 = vmatpush.msra.mxu3 %v942_v7  ;;  %v2152_v2 = vld [vmem:[#allocation60_spill] sm:$0xff]  ;;  %v2155_v5 = vld [vmem:[#allocation69_spill] sm:$0xff] }
  0x4e   :  { %461 = vmatpush.msra.mxu2 %v937_v6  ;;  %481 = vmatpush.msra.mxu3 %v959_v10  ;;  %v2156_v6 = vld [vmem:[#allocation68_spill] sm:$0xff]  ;;  %v1765_v10 = vld [vmem:[%s2011_s3 + $0x10] sm:$0xff] }
  0x4f   :  { %v2157_v7 = vld [vmem:[#allocation72_spill] sm:$0xff] }
  0x50   :  { %462 = vmatpush.msra.mxu2 %v966_v11  ;;  %482 = vmatpush.msra.mxu3 %v983_v14  ;;  %v1777_v11 = vld [vmem:[%s2011_s3] sm:$0xff]  ;;  %v1788_v14 = vld [vmem:[%s2013_s5 + $0x70] sm:$0xff] }
  0x52   :  { %463 = vmatpush.msra.mxu2 %v995_v16  ;;  %483 = vmatpush.msra.mxu3 %v1007_v18  ;;  %v2158_v16 = vld [vmem:[#allocation5_spill] sm:$0xff]  ;;  %v2159_v18 = vld [vmem:[#allocation6_spill] sm:$0xff] }
  0x54   :  { %464 = vmatpush.msra.mxu2 %v1019_v20  ;;  %484 = vmatpush.msra.mxu3 %v1031_v22  ;;  %v2160_v20 = vld [vmem:[#allocation8_spill] sm:$0xff]  ;;  %v2161_v22 = vld [vmem:[#allocation10_spill] sm:$0xff] }
  0x56   :  { %465 = vmatpush.msra.mxu2 %v1043_v24  ;;  %485 = vmatpush.msra.mxu3 %v1055_v26  ;;  %v2162_v24 = vld [vmem:[#allocation13_spill] sm:$0xff]  ;;  %v1823_v26 = vld [vmem:[%s2013_s5 + $0x48] sm:$0xff] }
  0x58   :  { %466 = vmatpush.msra.mxu2 %v1067_v28  ;;  %486 = vmatpush.msra.mxu3 %v1079_v30  ;;  %v2164_v30 = vld [vmem:[#allocation17_spill] sm:$0xff] }
  0x5a   :  { %467 = vmatpush.msra.mxu2 %v1091_v32  ;;  %487 = vmatpush.msra.mxu3 %v1103_v34  ;;  %v2165_v32 = vld [vmem:[#allocation19_spill] sm:$0xff] }
  0x5c   :  { %468 = vmatpush.msra.mxu2 %v1115_v36  ;;  %488 = vmatpush.msra.mxu3 %v1127_v38  ;;  %v2167_v38 = vld [vmem:[#allocation23_spill] sm:$0xff] }
  0x5e   :  { %469 = vmatpush.msra.mxu2 %v1139_v40  ;;  %489 = vmatpush.msra.mxu3 %v1151_v42 }
  0x60   :  { %470 = vmatpush.msra.mxu2 %v1163_v44  ;;  %490 = vmatpush.msra.mxu3 %v1175_v46  ;;  %v2169_v44 = vld [vmem:[#allocation27_spill] sm:$0xff]  ;;  %v2170_v46 = vld [vmem:[#allocation29_spill] sm:$0xff] }
  0x62   :  { %471 = vmatpush.msra.mxu2 %v1187_v48  ;;  %491 = vmatpush.msra.mxu3 %v1199_v50  ;;  %v2171_v48 = vld [vmem:[#allocation31_spill] sm:$0xff] }
  0x64   :  { %472 = vmatpush.msra.mxu2 %v1211_v52  ;;  %492 = vmatpush.msra.mxu3 %v1223_v54  ;;  %v2173_v54 = vld [vmem:[#allocation35_spill] sm:$0xff] }
  0x66   :  { %473 = vmatpush.msra.mxu2 %v1235_v56  ;;  %493 = vmatpush.msra.mxu3 %v1247_v58  ;;  %v2175_v56 = vld [vmem:[#allocation38_spill] sm:$0xff] }
  0x67   :  { %v2177_v58 = vld [vmem:[#allocation42_spill] sm:$0xff] }
  0x68   :  { %474 = vmatpush.msra.mxu2 %v1259_v60  ;;  %494 = vmatpush.msra.mxu3 %v1283_v55  ;;  %v2174_v55 = vld [vmem:[#allocation36_spill] sm:$0xff]  ;;  %v2179_v60 = vld [vmem:[#allocation46_spill] sm:$0xff] }
  0x6a   :  { %539 = vmatpush.msrb.mxu2 %v1271_v62  ;;  %559 = vmatpush.msrb.mxu3 %v1300_v59  ;;  %v2178_v59 = vld [vmem:[#allocation44_spill] sm:$0xff]  ;;  %v2181_v62 = vld [vmem:[#allocation50_spill] sm:$0xff] }
  0x6c   :  { %540 = vmatpush.msrb.mxu2 %v1295_v47  ;;  %560 = vmatpush.msrb.mxu3 %v1324_v31 }
  0x6e   :  { %541 = vmatpush.msrb.mxu2 %v1319_v35  ;;  %561 = vmatpush.msrb.mxu3 %v1348_v19  ;;  %v1802_v19 = vld [vmem:[%s2013_s5 + $0x60] sm:$0xff] }
  0x6f   :  { %v2166_v35 = vld [vmem:[#allocation21_spill] sm:$0xff] }
  0x70   :  { %542 = vmatpush.msrb.mxu2 %v1343_v23  ;;  %562 = vmatpush.msrb.mxu3 %v1372_v9  ;;  %v1759_v9 = vld [vmem:[%s2011_s3 + $0x18] sm:$0xff]  ;;  %v1816_v23 = vld [vmem:[%s2013_s5 + $0x50] sm:$0xff] }
  0x71   :  { %342 = vmatpush.msra.mxu0 %v1759_v9 }
  0x72   :  { %543 = vmatpush.msrb.mxu2 %v1367_v13  ;;  %563 = vmatpush.msrb.mxu3 %v1396_v43  ;;  %v1783_v13 = vld [vmem:[%s2013_s5 + $0x78] sm:$0xff] }
  0x73   :  { %343 = vmatpush.msra.mxu0 %v1765_v10  ;;  %401 = vmatpush.msra.mxu1 %v1783_v13 }
  0x74   :  { %544 = vmatpush.msrb.mxu2 %v1391_v27  ;;  %564 = vmatpush.msrb.mxu3 %v1420_v61  ;;  %v2163_v27 = vld [vmem:[#allocation15_spill] sm:$0xff]  ;;  %v2180_v61 = vld [vmem:[#allocation48_spill] sm:$0xff] }
  0x75   :  { %402 = vmatpush.msra.mxu1 %v1788_v14 }
  0x76   :  { %545 = vmatpush.msrb.mxu2 %v1415_v63  ;;  %565 = vmatpush.msrb.mxu3 %v1444_v53  ;;  %v2182_v63 = vld [vmem:[#allocation52_spill] sm:$0xff] }
  0x78   :  { %546 = vmatpush.msrb.mxu2 %v1439_v57  ;;  %566 = vmatpush.msrb.mxu3 %v1468_v45  ;;  %v2176_v57 = vld [vmem:[#allocation40_spill] sm:$0xff] }
  0x7a   :  { %547 = vmatpush.msrb.mxu2 %v1461_v49  ;;  %567 = vmatpush.msrb.mxu3 %v1492_v37 }
  0x7c   :  { %548 = vmatpush.msrb.mxu2 %v1487_v51  ;;  %568 = vmatpush.msrb.mxu3 %v1516_v29  ;;  %v1830_v29 = vld [vmem:[%s2013_s5 + $0x40] sm:$0xff] }
  0x7d   :  { %v2172_v51 = vld [vmem:[#allocation33_spill] sm:$0xff] }
  0x7e   :  { %549 = vmatpush.msrb.mxu2 %v1511_v33  ;;  %569 = vmatpush.msrb.mxu3 %v1545_v17  ;;  %v1795_v17 = vld [vmem:[%s2013_s5 + $0x68] sm:$0xff] }
  0x7f   :  { %403 = vmatpush.msra.mxu1 %v1795_v17 }
  0x80   :  { %550 = vmatpush.msrb.mxu2 %v1538_v21  ;;  %570 = vmatpush.msrb.mxu3 %v2151_v0  ;;  %v1809_v21 = vld [vmem:[%s2013_s5 + $0x58] sm:$0xff]  ;;  %v2185_v0 = vld [vmem:[#allocation58_spill] sm:$0xff] }
  0x81   :  { %404 = vmatpush.msra.mxu1 %v1802_v19 }
  0x82   :  { %551 = vmatpush.msrb.mxu2 %v2152_v2  ;;  %571 = vmatpush.msrb.mxu3 %v2153_v3  ;;  %v2186_v2 = vld [vmem:[#allocation62_spill] sm:$0xff] }
  0x83   :  { %405 = vmatpush.msra.mxu1 %v1809_v21  ;;  %v2187_v3 = vld [vmem:[#allocation66_spill] sm:$0xff] }
  0x84   :  { %552 = vmatpush.msrb.mxu2 %v2154_v4  ;;  %572 = vmatpush.msrb.mxu3 %v2155_v5  ;;  %v2188_v4 = vld [vmem:[#allocation70_spill] sm:$0xff]  ;;  %v1864_v5 = vld [vmem:[%s2013_s5 + $0x38] sm:$0xff] }
  0x85   :  { %406 = vmatpush.msra.mxu1 %v1816_v23 }
  0x86   :  { %553 = vmatpush.msrb.mxu2 %v2156_v6  ;;  %573 = vmatpush.msrb.mxu3 %v1648_v1  ;;  %v1771_v1 = vld [vmem:[%s2011_s3 + $0x8] sm:$0xff]  ;;  %v1870_v6 = vld [vmem:[%s2013_s5 + $0x30] sm:$0xff] }
  0x87   :  { %344 = vmatpush.msra.mxu0 %v1771_v1  ;;  %407 = vmatpush.msra.mxu1 %v1823_v26 }
  0x88   :  { %554 = vmatpush.msrb.mxu2 %v2157_v7  ;;  %574 = vmatpush.msrb.mxu3 %v1675_v12  ;;  %v2184_v12 = vld [vmem:[#allocation56_spill] sm:$0xff]  ;;  %v1876_v7 = vld [vmem:[%s2013_s5 + $0x28] sm:$0xff] }
  0x89   :  { %345 = vmatpush.msra.mxu0 %v1777_v11  ;;  %408 = vmatpush.msra.mxu1 %v1830_v29 }
  0x8b   :  { %499 = vmatpush.msrb.mxu0 %v2158_v16  ;;  %409 = vmatpush.msra.mxu1 %v1864_v5  ;;  %v1888_v16 = vld [vmem:[%s2013_s5 + $0x18] sm:$0xff] }
  0x8d   :  { %500 = vmatpush.msrb.mxu0 %v2159_v18  ;;  %410 = vmatpush.msra.mxu1 %v1870_v6  ;;  %v1894_v18 = vld [vmem:[%s2013_s5 + $0x10] sm:$0xff] }
  0x8f   :  { %501 = vmatpush.msrb.mxu0 %v2160_v20  ;;  %411 = vmatpush.msra.mxu1 %v1876_v7  ;;  %v1900_v20 = vld [vmem:[%s2013_s5 + $0x8] sm:$0xff] }
  0x91   :  { %502 = vmatpush.msrb.mxu0 %v2161_v22  ;;  %v1906_v22 = vld [vmem:[%s2013_s5] sm:$0xff] }
  0x93   :  { %503 = vmatpush.msrb.mxu0 %v2162_v24  ;;  %v2189_v24 = vld [vmem:[#allocation7_spill] sm:$0xff] }
  0x95   :  { %504 = vmatpush.msrb.mxu0 %v2163_v27  ;;  %v2190_v27 = vld [vmem:[#allocation9_spill] sm:$0xff] }
  0x97   :  { %505 = vmatpush.msrb.mxu0 %v2164_v30  ;;  %v2192_v30 = vld [vmem:[#allocation12_spill] sm:$0xff] }
  0x99   :  { %506 = vmatpush.msrb.mxu0 %v2165_v32  ;;  %v2194_v32 = vld [vmem:[#allocation16_spill] sm:$0xff] }
  0x9b   :  { %507 = vmatpush.msrb.mxu0 %v2166_v35 }
  0x9d   :  { %508 = vmatpush.msrb.mxu0 %v2167_v38 }
  0x9f   :  { %509 = vmatpush.msrb.mxu0 %v2168_v41 }
  0xa1   :  { %510 = vmatpush.msrb.mxu0 %v2169_v44 }
  0xa3   :  { %511 = vmatpush.msrb.mxu0 %v2170_v46  ;;  %v2200_v46 = vld [vmem:[#allocation28_spill] sm:$0xff] }
  0xa5   :  { %512 = vmatpush.msrb.mxu0 %v2171_v48 }
  0xa7   :  { %513 = vmatpush.msrb.mxu0 %v2172_v51 }
  0xa9   :  { %514 = vmatpush.msrb.mxu0 %v2173_v54 }
  0xba   :  { %v179_v28 = vpop.f32.mrf.mxu0 }
  0xbd   :  { %v199_v31 = vpop.f32.mrf.mxu1 }
  0xbe   :  { %v200_v33 = vadd.f32 %v199_v31, %v179_v28  ;;  %v219_v34 = vpop.f32.mrf.mxu2  ;;  %v2191_v28 = vld [vmem:[#allocation11_spill] sm:$0xff]  ;;  %v2193_v31 = vld [vmem:[#allocation14_spill] sm:$0xff] }
  0xc0   :  { %v220_v36 = vadd.f32 %v219_v34, %v200_v33  ;;  %v2195_v33 = vld [vmem:[#allocation18_spill] sm:$0xff]  ;;  %v2196_v34 = vld [vmem:[#allocation20_spill] sm:$0xff] }
  0xc1   :  { %v239_v37 = vpop.f32.mrf.mxu3 }
  0xc2   :  { %v240_v40 = vadd.f32 %v239_v37, %v220_v36  ;;  %v2197_v36 = vld [vmem:[#allocation22_spill] sm:$0xff] }
  0xc4   :  { %v259_v42 = vpop.f32.mrf.mxu0 }
  0xc5   :  { %v260_v43 = vadd.f32 %v259_v42, %v240_v40  ;;  %v2198_v40 = vld [vmem:[#allocation24_spill] sm:$0xff] }
  0xc6   :  { %v279_v45 = vpop.f32.mrf.mxu1 }
  0xc7   :  { %v280_v47 = vadd.f32 %v279_v45, %v260_v43  ;;  %v2199_v43 = vld [vmem:[#allocation26_spill] sm:$0xff] }
  0xca   :  { %v299_v49 = vpop.f32.mrf.mxu2 }
  0xcb   :  { %v300_v50 = vadd.f32 %v299_v49, %v280_v47  ;;  %v2201_v49 = vld [vmem:[#allocation30_spill] sm:$0xff] }
  0xcc   :  { %v319_v52 = vpop.f32.mrf.mxu3 }
  0xcd   :  { %v320_v53 = vadd.f32 %v319_v52, %v300_v50  ;;  %v2202_v52 = vld [vmem:[#allocation32_spill] sm:$0xff] }
  0xcf   :  { %830 = vmatmul.msk.f32.vlgmr.msra.gmra.mxu0 %vm326_vm0, %v320_v53 }
  0xd0   :  { %579 = vmatpush.msra.mxu0 %v2174_v55  ;;  %v2203_v55 = vld [vmem:[#allocation34_spill] sm:$0xff] }
  0xd2   :  { %580 = vmatpush.msra.mxu0 %v2175_v56 }
  0xd4   :  { %581 = vmatpush.msra.mxu0 %v2176_v57 }
  0xd6   :  { %582 = vmatpush.msra.mxu0 %v2177_v58  ;;  %v2204_v58 = vld [vmem:[#allocation37_spill] sm:$0xff] }
  0xd8   :  { %583 = vmatpush.msra.mxu0 %v2178_v59 }
  0xda   :  { %584 = vmatpush.msra.mxu0 %v2179_v60 }
  0xdc   :  { %585 = vmatpush.msra.mxu0 %v2180_v61 }
  0xde   :  { %586 = vmatpush.msra.mxu0 %v2181_v62 }
  0xe0   :  { %587 = vmatpush.msra.mxu0 %v2182_v63  ;;  %v451_v63 = vld [vmem:[%s2009_s1] sm:$0xff] }
  0xe1   :  { %475 = vmatmul.f32.vlgmr.msra.gmra.mxu2 %v451_v63 }
  0xe2   :  { %588 = vmatpush.msra.mxu0 %v2183_v25  ;;  %v452_v25 = vld [vmem:[%s2009_s1 + $0x8] sm:$0xff]  ;;  %634 = vmatpush.msra.mxu2 %v1759_v9 }
  0xe3   :  { %495 = vmatmul.f32.vlgmr.msra.gmra.mxu3 %v452_v25 }
  0xe4   :  { %589 = vmatpush.msra.mxu0 %v2184_v12  ;;  %635 = vmatpush.msra.mxu2 %v1765_v10  ;;  %v453_v10 = vld [vmem:[%s2009_s1 + $0x10] sm:$0xff] }
  0xe5   :  { %675 = vmatpush.msra.mxu3 %v1783_v13  ;;  %515 = vmatmul.f32.vlgmr.msrb.gmra.mxu0 %v453_v10 }
  0xe6   :  { %590 = vmatpush.msra.mxu0 %v2185_v0  ;;  %636 = vmatpush.msra.mxu2 %v1771_v1  ;;  %v456_v1 = vld [vmem:[%s2009_s1 + $0x28] sm:$0xff] }
  0xe7   :  { %676 = vmatpush.msra.mxu3 %v1788_v14  ;;  %v1952_v14 = vld [vmem:[%s2012_s4] ss:$0 sm:$0xff] }
  0xe8   :  { %591 = vmatpush.msra.mxu0 %v2186_v2  ;;  %637 = vmatpush.msra.mxu2 %v1777_v11 }
  0xe9   :  { %677 = vmatpush.msra.mxu3 %v1795_v17 }
  0xea   :  { %592 = vmatpush.msra.mxu0 %v2187_v3 }
  0xeb   :  { %678 = vmatpush.msra.mxu3 %v1802_v19  ;;  %v1958_v19 = vld [vmem:[%s2012_s4 + $0x1] ss:$0 sm:$0xff] }
  0xec   :  { %593 = vmatpush.msra.mxu0 %v2188_v4  ;;  %v455_v4 = vld [vmem:[%s2009_s1 + $0x20] sm:$0xff]  ;;  %575 = vmatmul.f32.vlgmr.msrb.gmra.mxu3 %v456_v1 }
  0xed   :  { %555 = vmatmul.f32.vlgmr.msrb.gmra.mxu2 %v455_v4  ;;  %679 = vmatpush.msra.mxu3 %v1809_v21 }
  0xee   :  { %594 = vmatpush.msra.mxu0 %v1655_v8  ;;  %v1882_v8 = vld [vmem:[%s2013_s5 + $0x20] sm:$0xff]  ;;  %s864_s5 = smov [#allocation2]  }
  0xef   :  { %412 = vmatpush.msra.mxu1 %v1882_v8  ;;  %680 = vmatpush.msra.mxu3 %v1816_v23 }
  0xf1   :  { %413 = vmatpush.msra.mxu1 %v1888_v16  ;;  %681 = vmatpush.msra.mxu3 %v1823_v26  ;;  %v2206_v26 = vld [vmem:[#allocation41_spill] sm:$0xff] }
  0xf3   :  { %414 = vmatpush.msra.mxu1 %v1894_v18  ;;  %682 = vmatpush.msra.mxu3 %v1830_v29  ;;  %v454_v29 = vld [vmem:[%s2009_s1 + $0x18] sm:$0xff] }
  0xf5   :  { %415 = vmatpush.msra.mxu1 %v1900_v20  ;;  %683 = vmatpush.msra.mxu3 %v1864_v5  ;;  %v2208_v5 = vld [vmem:[#allocation45_spill] sm:$0xff] }
  0xf7   :  { %416 = vmatpush.msra.mxu1 %v1906_v22  ;;  %684 = vmatpush.msra.mxu3 %v1870_v6  ;;  %v2209_v6 = vld [vmem:[#allocation47_spill] sm:$0xff] }
  0xf9   :  { %519 = vmatpush.msrb.mxu1 %v2189_v24  ;;  %685 = vmatpush.msra.mxu3 %v1876_v7  ;;  %v2210_v7 = vld [vmem:[#allocation49_spill] sm:$0xff] }
  0xfb   :  { %520 = vmatpush.msrb.mxu1 %v2190_v27  ;;  %v457_v27 = vld [vmem:[%s2009_s1 + $0x30] sm:$0xff]  ;;  %686 = vmatpush.msra.mxu3 %v1882_v8 }
  0xfc   :  { %595 = vmatmul.f32.vlgmr.msra.gmra.mxu0 %v457_v27  ;;  %v2211_v8 = vld [vmem:[#allocation51_spill] sm:$0xff] }
  0xfd   :  { %521 = vmatpush.msrb.mxu1 %v2191_v28  ;;  %687 = vmatpush.msra.mxu3 %v1888_v16  ;;  %v2214_v16 = vld [vmem:[#allocation57_spill] sm:$0xff] }
  0xff   :  { %522 = vmatpush.msrb.mxu1 %v2192_v30  ;;  %v2205_v30 = vld [vmem:[#allocation39_spill] sm:$0xff]  ;;  %688 = vmatpush.msra.mxu3 %v1894_v18 }
 0x100   :  { %v2216_v18 = vld [vmem:[#allocation63_spill] sm:$0xff] }
 0x101   :  { %523 = vmatpush.msrb.mxu1 %v2193_v31  ;;  %v2207_v31 = vld [vmem:[#allocation43_spill] sm:$0xff]  ;;  %689 = vmatpush.msra.mxu3 %v1900_v20  ;;  %v458_v20 = vld [vmem:[%s2009_s1 + $0x38] sm:$0xff] }
 0x103   :  { %524 = vmatpush.msrb.mxu1 %v2194_v32  ;;  %690 = vmatpush.msra.mxu3 %v1906_v22  ;;  %v2212_v32 = vld [vmem:[#allocation53_spill] sm:$0xff] }
 0x105   :  { %525 = vmatpush.msrb.mxu1 %v2195_v33  ;;  %v2213_v33 = vld [vmem:[#allocation55_spill] sm:$0xff] }
 0x107   :  { %526 = vmatpush.msrb.mxu1 %v2196_v34  ;;  %v2215_v34 = vld [vmem:[#allocation59_spill] sm:$0xff] }
 0x109   :  { %527 = vmatpush.msrb.mxu1 %v2197_v36  ;;  %v2218_v36 = vld [vmem:[#allocation71_spill] sm:$0xff] }
 0x10b   :  { %528 = vmatpush.msrb.mxu1 %v2198_v40 }
 0x10d   :  { %529 = vmatpush.msrb.mxu1 %v2199_v43 }
 0x10f   :  { %530 = vmatpush.msrb.mxu1 %v2200_v46 }
 0x111   :  { %531 = vmatpush.msrb.mxu1 %v2201_v49 }
 0x113   :  { %532 = vmatpush.msrb.mxu1 %v2202_v52 }
 0x115   :  { %533 = vmatpush.msrb.mxu1 %v2203_v55 }
 0x117   :  { %534 = vmatpush.msrb.mxu1 %v2204_v58 }
 0x14c   :  { %v347_v35 = vpop.f32.mrf.mxu0 }
 0x14d   :  { %v350_v37 = vrot.slane %v347_v35, 4  ;;  %v356_v38 = vmul.f32 %v347_v35, %v347_v35 }
 0x14f   :  { %v351_v41 = vadd.f32 %v350_v37, %v347_v35  ;;  %v357_v42 = vrot.slane %v356_v38, 4 }
 0x151   :  { %v352_v44 = vrot.slane %v351_v41, 2  ;;  %v358_v45 = vadd.f32 %v357_v42, %v356_v38 }
 0x153   :  { %v353_v47 = vadd.f32 %v352_v44, %v351_v41  ;;  %v359_v48 = vrot.slane %v358_v45, 2 }
 0x155   :  { %v354_v50 = vrot.slane %v353_v47, 1  ;;  %v360_v51 = vadd.f32 %v359_v48, %v358_v45 }
 0x157   :  { %v355_v53 = vadd.f32 %v354_v50, %v353_v47  ;;  %v361_v54 = vrot.slane %v360_v51, 1 }
 0x159   :  { %v362_v56 = vadd.f32 %v361_v54, %v360_v51  ;;  %v363_v57 = vmul.f32 0.125, %v355_v53 }
 0x15b   :  { %v364_v59 = vmul.f32 0.125, %v362_v56  ;;  %v365_v60 = vmul.f32 %v363_v57, %v363_v57  ;;  %v367_v11 = vsub.f32 %v347_v35, %v363_v57  ;;  %v2217_v35 = vld [vmem:[#allocation67_spill] sm:$0xff] }
 0x15d   :  { %v366_v61 = vsub.f32 %v364_v59, %v365_v60 }
 0x15f   :  { %v368_v62 = vadd.f32 1e-05, %v366_v61 }
 0x161   :  { %842 = vrsqrt.f32 %v368_v62  ;;  %vm375_vm2 = vweird.f32 %v368_v62 }
 0x162   :  { %v516_v52 = vpop.f32.mrf.mxu0 }
 0x166   :  { %v496_v46 = vpop.f32.mrf.mxu3 }
 0x167   :  { %v843_v12 = vpop.eup %842 }
 0x168   :  { %v370_v0 = vmul.f32 %v843_v12, %v368_v62  ;;  %vm376_vm1 = vweird.f32 %v843_v12 }
 0x169   :  { %vm377_vm3 = vmor %vm375_vm2, %vm376_vm1 }
 0x16a   :  { %v371_v2 = vmul.f32 %v843_v12, %v370_v0 }
 0x16c   :  { %v372_v3 = vmul.f32 0.5, %v371_v2 }
 0x16e   :  { %v373_v9 = vsub.f32 1.5, %v372_v3 }
 0x16f   :  { %v576_v63 = vpop.f32.mrf.mxu3 }
 0x170   :  { %v374_v13 = vmul.f32 %v843_v12, %v373_v9 }
 0x172   :  { %v378_v17 = vsel %vm377_vm3, %v843_v12, %v374_v13 }
 0x173   :  { %v379_v24 = vmul.f32 %v378_v17, %v367_v11 }
 0x175   :  { %v381_v21 = vmul.f32 %v1952_v14, %v379_v24 }
 0x177   :  { %v383_v28 = vadd.f32 %v1958_v19, %v381_v21 }
 0x179   :  { %v384_v23 = vmax.f32 %v383_v28, 0.0  ;;  %v596_v2 = vpop.f32.mrf.mxu0 }
 0x17b   :  { %417 = vmatmul.f32.vlgmr.msra.gmra.mxu1 %v384_v23 }
 0x17c   :  { %599 = vmatpush.msra.mxu1 %v2205_v30 }
 0x17e   :  { %600 = vmatpush.msra.mxu1 %v2206_v26 }
 0x180   :  { %601 = vmatpush.msra.mxu1 %v2207_v31 }
 0x182   :  { %602 = vmatpush.msra.mxu1 %v2208_v5 }
 0x183   :  { %535 = vmatmul.f32.vlgmr.msrb.gmra.mxu1 %v454_v29 }
 0x184   :  { %603 = vmatpush.msra.mxu1 %v2209_v6 }
 0x186   :  { %604 = vmatpush.msra.mxu1 %v2210_v7 }
 0x188   :  { %605 = vmatpush.msra.mxu1 %v2211_v8 }
 0x18a   :  { %606 = vmatpush.msra.mxu1 %v2212_v32 }
 0x18c   :  { %607 = vmatpush.msra.mxu1 %v2213_v33 }
 0x18e   :  { %608 = vmatpush.msra.mxu1 %v2214_v16 }
 0x190   :  { %609 = vmatpush.msra.mxu1 %v2215_v34 }
 0x192   :  { %610 = vmatpush.msra.mxu1 %v2216_v18 }
 0x194   :  { %611 = vmatpush.msra.mxu1 %v2217_v35 }
 0x196   :  { %612 = vmatpush.msra.mxu1 %v2218_v36 }
 0x198   :  { %613 = vmatpush.msra.mxu1 %v1660_v15  ;;  %v476_v15 = vpop.f32.mrf.mxu2 }
 0x199   :  { %v497_v51 = vadd.f32 %v496_v46, %v476_v15 }
 0x19a   :  { %614 = vmatpush.msra.mxu1 %v1680_v39 }
 0x19b   :  { %615 = vmatmul.f32.vlgmr.msra.gmra.mxu1 %v458_v20  ;;  %v517_v56 = vadd.f32 %v516_v52, %v497_v51 }
 0x1a0   :  { %v556_v61 = vpop.f32.mrf.mxu2 }
 0x1f8   :  { %v418_v22 = vpop.f32.mrf.mxu1 }
 0x1f9   :  { %v421_v37 = vrot.slane %v418_v22, 4  ;;  %v427_v38 = vmul.f32 %v418_v22, %v418_v22 }
 0x1fb   :  { %v422_v40 = vadd.f32 %v421_v37, %v418_v22  ;;  %v428_v41 = vrot.slane %v427_v38, 4 }
 0x1fd   :  { %v423_v42 = vrot.slane %v422_v40, 2  ;;  %v429_v43 = vadd.f32 %v428_v41, %v427_v38 }
 0x1ff   :  { %v424_v44 = vadd.f32 %v423_v42, %v422_v40  ;;  %v430_v45 = vrot.slane %v429_v43, 2 }
 0x200   :  { %v536_v57 = vpop.f32.mrf.mxu1 }
 0x201   :  { %v425_v47 = vrot.slane %v424_v44, 1  ;;  %v431_v48 = vadd.f32 %v430_v45, %v429_v43  ;;  %v537_v60 = vadd.f32 %v536_v57, %v517_v56 }
 0x203   :  { %v426_v49 = vadd.f32 %v425_v47, %v424_v44  ;;  %v432_v50 = vrot.slane %v431_v48, 1  ;;  %v557_v62 = vadd.f32 %v556_v61, %v537_v60 }
 0x205   :  { %v433_v53 = vadd.f32 %v432_v50, %v431_v48  ;;  %v434_v39 = vmul.f32 0.125, %v426_v49  ;;  %v577_v12 = vadd.f32 %v576_v63, %v557_v62 }
 0x207   :  { %v435_v54 = vmul.f32 0.125, %v433_v53  ;;  %v436_v55 = vmul.f32 %v434_v39, %v434_v39  ;;  %v597_v4 = vadd.f32 %v596_v2, %v577_v12  ;;  %v438_v17 = vsub.f32 %v418_v22, %v434_v39 }
 0x209   :  { %v437_v58 = vsub.f32 %v435_v54, %v436_v55 }
 0x20b   :  { %v439_v59 = vadd.f32 1e-05, %v437_v58 }
 0x20d   :  { %844 = vrsqrt.f32 %v439_v59  ;;  %vm446_vm5 = vweird.f32 %v439_v59 }
 0x213   :  { %v845_v25 = vpop.eup %844 }
 0x214   :  { %v441_v0 = vmul.f32 %v845_v25, %v439_v59  ;;  %vm447_vm4 = vweird.f32 %v845_v25 }
 0x215   :  { %vm448_vm6 = vmor %vm446_vm5, %vm447_vm4 }
 0x216   :  { %v442_v3 = vmul.f32 %v845_v25, %v441_v0 }
 0x218   :  { %v616_v9 = vpop.f32.mrf.mxu1  ;;  %v443_v10 = vmul.f32 0.5, %v442_v3 }
 0x219   :  { %v617_v1 = vadd.f32 %v616_v9, %v597_v4 }
 0x21a   :  { %v444_v13 = vsub.f32 1.5, %v443_v10 }
 0x21b   :  { %831 = vmatmul.msk.f32.vlgmr.msra.gmra.mxu2 %vm326_vm0, %v617_v1 }
 0x21c   :  { %v445_v11 = vmul.f32 %v845_v25, %v444_v13 }
 0x21e   :  { %v449_v24 = vsel %vm448_vm6, %v845_v25, %v445_v11 }
 0x21f   :  { %v1998_v21 = vmul.f32 %v449_v24, %v438_v17 }
 0x221   :  { %772 = vmatpush.xpose.msrb.mxu0 %v1998_v21 }
 0x224   :  { %773 = vmatmul.f32.vlgmr.msrb.gmra.mxu0 %v1998_v21 }
 0x29e   :  { %v639_v27 = vpop.f32.mrf.mxu2 }
 0x29f   :  { %v642_v28 = vrot.slane %v639_v27, 4  ;;  %v648_v23 = vmul.f32 %v639_v27, %v639_v27 }
 0x2a1   :  { %v643_v30 = vadd.f32 %v642_v28, %v639_v27  ;;  %v649_v26 = vrot.slane %v648_v23, 4 }
 0x2a3   :  { %v644_v31 = vrot.slane %v643_v30, 2  ;;  %v650_v29 = vadd.f32 %v649_v26, %v648_v23 }
 0x2a5   :  { %v645_v5 = vadd.f32 %v644_v31, %v643_v30  ;;  %v651_v6 = vrot.slane %v650_v29, 2 }
 0x2a7   :  { %v646_v7 = vrot.slane %v645_v5, 1  ;;  %v652_v8 = vadd.f32 %v651_v6, %v650_v29 }
 0x2a9   :  { %v647_v32 = vadd.f32 %v646_v7, %v645_v5  ;;  %v653_v33 = vrot.slane %v652_v8, 1  ;;  %v774_v7 = vpop.f32.mrf.mxu0 }
 0x2ab   :  { %v654_v16 = vadd.f32 %v653_v33, %v652_v8  ;;  %v655_v34 = vmul.f32 0.125, %v647_v32 }
 0x2ad   :  { %v656_v18 = vmul.f32 0.125, %v654_v16  ;;  %v657_v35 = vmul.f32 %v655_v34, %v655_v34  ;;  %v659_v43 = vsub.f32 %v639_v27, %v655_v34 }
 0x2af   :  { %v658_v36 = vsub.f32 %v656_v18, %v657_v35 }
 0x2b1   :  { %v660_v20 = vadd.f32 1e-05, %v658_v36 }
 0x2b3   :  { %846 = vrsqrt.f32 %v660_v20  ;;  %vm667_vm8 = vweird.f32 %v660_v20 }
 0x2b9   :  { %v847_v22 = vpop.eup %846 }
 0x2ba   :  { %v662_v37 = vmul.f32 %v847_v22, %v660_v20  ;;  %vm668_vm7 = vweird.f32 %v847_v22 }
 0x2bb   :  { %vm669_vm9 = vmor %vm667_vm8, %vm668_vm7 }
 0x2bc   :  { %v663_v38 = vmul.f32 %v847_v22, %v662_v37 }
 0x2be   :  { %v664_v40 = vmul.f32 0.5, %v663_v38 }
 0x2c0   :  { %v665_v41 = vsub.f32 1.5, %v664_v40 }
 0x2c2   :  { %v666_v42 = vmul.f32 %v847_v22, %v665_v41 }
 0x2c4   :  { %v670_v44 = vsel %vm669_vm9, %v847_v22, %v666_v42 }
 0x2c5   :  { %v671_v45 = vmul.f32 %v670_v44, %v659_v43 }
 0x2c7   :  { %v672_v46 = vmul.f32 %v1952_v14, %v671_v45 }
 0x2c9   :  { %v673_v47 = vadd.f32 %v1958_v19, %v672_v46 }
 0x2cb   :  { %v674_v48 = vmax.f32 %v673_v47, 0.0 }
 0x2cd   :  { %691 = vmatmul.f32.vlgmr.msra.gmra.mxu3 %v674_v48 }
 0x350   :  { %v692_v15 = vpop.f32.mrf.mxu3 }
 0x351   :  { %v695_v49 = vrot.slane %v692_v15, 4  ;;  %v701_v50 = vmul.f32 %v692_v15, %v692_v15 }
 0x353   :  { %v696_v51 = vadd.f32 %v695_v49, %v692_v15  ;;  %v702_v52 = vrot.slane %v701_v50, 4 }
 0x355   :  { %v697_v53 = vrot.slane %v696_v51, 2  ;;  %v703_v39 = vadd.f32 %v702_v52, %v701_v50 }
 0x357   :  { %v698_v54 = vadd.f32 %v697_v53, %v696_v51  ;;  %v704_v55 = vrot.slane %v703_v39, 2 }
 0x359   :  { %v699_v56 = vrot.slane %v698_v54, 1  ;;  %v705_v57 = vadd.f32 %v704_v55, %v703_v39 }
 0x35b   :  { %v700_v58 = vadd.f32 %v699_v56, %v698_v54  ;;  %v706_v59 = vrot.slane %v705_v57, 1 }
 0x35d   :  { %v707_v60 = vadd.f32 %v706_v59, %v705_v57  ;;  %v708_v61 = vmul.f32 0.125, %v700_v58 }
 0x35f   :  { %v709_v14 = vmul.f32 0.125, %v707_v60  ;;  %v710_v62 = vmul.f32 %v708_v61, %v708_v61  ;;  %v712_v9 = vsub.f32 %v692_v15, %v708_v61 }
 0x361   :  { %v711_v19 = vsub.f32 %v709_v14, %v710_v62 }
 0x363   :  { %v713_v63 = vadd.f32 1e-05, %v711_v19 }
 0x365   :  { %848 = vrsqrt.f32 %v713_v63  ;;  %vm720_vm11 = vweird.f32 %v713_v63 }
 0x36b   :  { %v849_v25 = vpop.eup %848 }
 0x36c   :  { %v715_v12 = vmul.f32 %v849_v25, %v713_v63  ;;  %vm721_vm10 = vweird.f32 %v849_v25 }
 0x36d   :  { %vm722_vm12 = vmor %vm720_vm11, %vm721_vm10 }
 0x36e   :  { %v716_v0 = vmul.f32 %v849_v25, %v715_v12 }
 0x370   :  { %v717_v2 = vmul.f32 0.5, %v716_v0 }
 0x372   :  { %v718_v3 = vsub.f32 1.5, %v717_v2 }
 0x374   :  { %v719_v4 = vmul.f32 %v849_v25, %v718_v3 }
 0x376   :  { %v723_v10 = vsel %vm722_vm12, %v849_v25, %v719_v4 }
 0x377   :  { %v724_v1 = vmul.f32 %v723_v10, %v712_v9 }
 0x379   :  { %v725_v13 = vmul.f32 %v724_v1, %v1998_v21  ;;  %792 = vmatpush.xpose.msrb.mxu2 %v724_v1 }
 0x37b   :  { %v726_v11 = vrot.slane %v725_v13, 4 }
 0x37c   :  { %793 = vmatmul.f32.vlgmr.msrb.gmra.mxu2 %v724_v1 }
 0x37d   :  { %v727_v17 = vadd.f32 %v726_v11, %v725_v13 }
 0x37f   :  { %v728_v24 = vrot.slane %v727_v17, 2 }
 0x381   :  { %v729_v27 = vadd.f32 %v728_v24, %v727_v17 }
 0x383   :  { %v730_v28 = vrot.slane %v729_v27, 1 }
 0x385   :  { %v731_v23 = vadd.f32 %v730_v28, %v729_v27 }
 0x387   :  { %v732_v30 = vmul.f32 0.125, %v731_v23 }
 0x389   :  { %v832_v26 = vadd.f32 -1.0, %v732_v30  ;;  %v746_v5 = vmul.f32 %v732_v30, %v732_v30 }
 0x38b   :  { %v734_v31 = vmul.f32 %v832_v26, %v832_v26  ;;  %v747_v6 = vsel %vm735_vm13, %v746_v5, 0.0 }
 0x38d   :  { %v736_v29 = vsel %vm735_vm13, %v734_v31, 0.0 }
 0x38e   :  { %737 = vadd.xlane.f32.xlu0 %v736_v29 }
 0x396   :  { %748 = vadd.xlane.f32.xlu0 %v747_v6 }
 0x3ff   :  { %v794_v8 = vpop.f32.mrf.mxu2 }
 0x400   :  { %v797_v21 = vmul.f32 %v794_v8, %v774_v7 }
 0x401   :  { %v738_v32 = vpop.xlane.xlu0 %737 }
 0x402   :  { %v739_v33 = vrot.slane %v738_v32, 4  ;;  %v799_v16 = vsel %vm798_vm14, %v797_v21, 0.0 }
 0x403   :  { %800 = vadd.xlane.f32.xlu1 %v799_v16 }
 0x404   :  { %v740_v34 = vadd.f32 %v739_v33, %v738_v32 }
 0x406   :  { %v741_v18 = vrot.slane %v740_v34, 2 }
 0x408   :  { %v742_v35 = vadd.f32 %v741_v18, %v740_v34 }
 0x409   :  { %v749_v36 = vpop.xlane.xlu0 %748 }
 0x40a   :  { %v750_v20 = vrot.slane %v749_v36, 4  ;;  %v743_v22 = vrot.slane %v742_v35, 1 }
 0x40c   :  { %v751_v37 = vadd.f32 %v750_v20, %v749_v36  ;;  %v744_v38 = vadd.f32 %v743_v22, %v742_v35 }
 0x40e   :  { %v752_v40 = vrot.slane %v751_v37, 2  ;;  %833 = vpush %v744_v38 }
 0x410   :  { %v753_v41 = vadd.f32 %v752_v40, %v751_v37 }
 0x412   :  { %v754_v42 = vrot.slane %v753_v41, 1 }
 0x414   :  { %v755_v43 = vadd.f32 %v754_v42, %v753_v41 }
 0x416   :  { %835 = vpush %v755_v43 }
 0x43f   :  { %s834_s1 = spop %833 }
 0x447   :  { %s836_s7 = spop %835 }
 0x476   :  { %v801_v44 = vpop.xlane.xlu1 %800 }
 0x477   :  { %v802_v45 = vrot.slane %v801_v44, 4 }
 0x479   :  { %v803_v46 = vadd.f32 %v802_v45, %v801_v44 }
 0x47b   :  { %v804_v47 = vrot.slane %v803_v46, 2 }
 0x47d   :  { %v805_v48 = vadd.f32 %v804_v47, %v803_v46 }
 0x47f   :  { %v806_v15 = vrot.slane %v805_v48, 1 }
 0x481   :  { %v807_v49 = vadd.f32 %v806_v15, %v805_v48 }
 0x483   :  { %837 = vpush %v807_v49 }
 0x4b4   :  { %s838_s8 = spop %837 }
 0x4b5   :  { %s809_s9 = smul.f32 0.015625, %s838_s8 }
 0x4b7   :  { %s810_s10 = ssub.f32 %s809_s9, %s836_s7 }
 0x4b9   :  { %s811_s14 = smul.f32 0.0051, %s810_s10 }
 0x4bb   :  { %s812_s15 = sadd.f32 %s834_s1, %s811_s14 }
 0x4bd   :  { %814 = sst [smem:[#allocation2]] %s812_s15 }
 0x4be   :  { %823 = dma.smem_to_hbm %s864_s5, 16, %s821_s13, [#allocation3]  }
 0x4bf   :  { %862 = dma.done.wait [#allocation3], 16  }
 0x4c0   :  { %863 = vsyncadd [#allocation3], 4294967280 }
 0x4c1   :  { %828 = sfence }
 0x4c2   :  { %829 = vsyncpa [#allocation3], 1 }

</bundles_post_ra>
